<compile_context>
chip_gen: v7x
topology: tpu7x:2x2x1
jax: 0.10.0
libtpu: 0.0.40
codegen_flags: <defaults>
</compile_context>

<pallas_src>
import numpy as np
import jax
import jax.numpy as jnp
from jax.experimental import pallas as pl
from jax.experimental.pallas import tpu as pltpu

# ----------------------------- model hyper-params (module defaults) ----------------------
NODE_FEAT = 9      # node_feat
HIDDEN    = 256    # hidden (module default; multiple of 128 -> MXU native)
LAYERS    = 4      # layers
OUT_DIM   = 1      # out
OUT_PAD   = 128    # lane-dense padded output width (sliced back to OUT_DIM in the wrapper)

# ----------------------------- batch layout ----------------------------------------------
N_GRAPHS        = 8    # graphs per pallas_call (grid axis, "parallel")
NODES_PER_GRAPH = 64   # padded per-graph node count (multiple of 8); total N = 512


def _gnn_kernel(x_ref, a_ref, pw_ref,
                we_ref, be_ref, wc_ref, bc_ref, wo_ref, bo_ref,
                out_ref):
    # One graph per grid step.
    x  = x_ref[0]    # (n, F)  bf16
    a  = a_ref[0]    # (n, n)  bf16  -- symmetric-normalized adjacency (PyG GCNConv norm)
    pw = pw_ref[0]   # (n, 1)  f32   -- 1/|graph| for real nodes, 0 for padding

    # x = relu(embed(x))            (MXU, f32 accumulate; bias/ReLU in f32)
    h = jnp.dot(x, we_ref[...], preferred_element_type=jnp.float32) + be_ref[...]
    h = jnp.maximum(h, 0.0)

    # for conv in convs: x = relu(A_hat @ (H @ W) + b)
    for l in range(LAYERS):
        hw = jnp.dot(h.astype(jnp.bfloat16), wc_ref[l],
                     preferred_element_type=jnp.float32)
        h = jnp.dot(a, hw.astype(jnp.bfloat16),
                    preferred_element_type=jnp.float32) + bc_ref[l]
        h = jnp.maximum(h, 0.0)

    # global_mean_pool: masked mean over the node (sublane) axis -> VPU/XLU, no MXU pass.
    pooled = jnp.sum(h * pw, axis=0, keepdims=True)               # (1, HIDDEN) f32

    # out(pooled): lane-padded to OUT_PAD for an unmasked lane-dense store.
    out = jnp.dot(pooled.astype(jnp.bfloat16), wo_ref[...],
                  preferred_element_type=jnp.float32) + bo_ref[...]
    out_ref[0] = out                                              # (1, OUT_PAD)


def sample_gnn_pallas(x, a_hat, pool_w, params):
    """x: (G, n, F) bf16, a_hat: (G, n, n) bf16, pool_w: (G, n, 1) f32."""
    we, be, wc, bc, wo, bo = params
    G, NPG, F = x.shape
    H = we.shape[1]

    flops_per_graph = (2 * NPG * F * H
                       + LAYERS * (2 * NPG * H * H + 2 * NPG * NPG * H)
                       + 2 * H * OUT_PAD)
    bytes_accessed = int(x.size * x.dtype.itemsize
                         + a_hat.size * a_hat.dtype.itemsize
                         + pool_w.size * pool_w.dtype.itemsize
                         + sum(int(p.size) * p.dtype.itemsize for p in params)
                         + G * OUT_PAD * 4)

    in_specs = [
        # per-graph streaming inputs
        pl.BlockSpec((1, NPG, F),   lambda g: (g, 0, 0)),
        pl.BlockSpec((1, NPG, NPG), lambda g: (g, 0, 0)),
        pl.BlockSpec((1, NPG, 1),   lambda g: (g, 0, 0)),
        # weights: constant index_maps -> resident in VMEM across grid steps
        pl.BlockSpec((F, H),          lambda g: (0, 0)),
        pl.BlockSpec((1, H),          lambda g: (0, 0)),
        pl.BlockSpec((LAYERS, H, H),  lambda g: (0, 0, 0)),
        pl.BlockSpec((LAYERS, 1, H),  lambda g: (0, 0, 0)),
        pl.BlockSpec((H, OUT_PAD),    lambda g: (0, 0)),
        pl.BlockSpec((1, OUT_PAD),    lambda g: (0, 0)),
    ]
    out_spec = pl.BlockSpec((1, 1, OUT_PAD), lambda g: (g, 0, 0))

    out = pl.pallas_call(
        _gnn_kernel,
        out_shape=jax.ShapeDtypeStruct((G, 1, OUT_PAD), jnp.float32),
        grid_spec=pltpu.PrefetchScalarGridSpec(
            num_scalar_prefetch=0,
            grid=(G,),
            in_specs=in_specs,
            out_specs=out_spec,
        ),
        compiler_params=pltpu.CompilerParams(
            dimension_semantics=("parallel",)),
        cost_estimate=pl.CostEstimate(
            flops=G * flops_per_graph,
            transcendentals=0,
            bytes_accessed=bytes_accessed),
    )(x, a_hat, pool_w, we, be, wc, bc, wo, bo)

    return out[:, 0, :OUT_DIM]          # slice back to (G, OUT_DIM)


# ----------------------------- glue: graph densification + params ------------------------
def build_graph_batch(num_graphs, npg):
    """Per-graph PyG-style GCN normalization, padded to npg nodes.

    Padded nodes get zero rows/cols in A_hat and zero pooling weight, so they never
    contribute to real-node activations or to the mean pool.
    """
    a_hat = np.zeros((num_graphs, npg, npg), np.float32)
    pool_w = np.zeros((num_graphs, npg, 1), np.float32)
    for g in range(num_graphs):
        n_real = npg - 2 * g - 2                       # variable graph sizes (62, 60, ...)
        a = np.zeros((npg, npg), np.float32)
        for i in range(n_real):                        # undirected ring over real nodes
            j = (i + 1) % n_real
            a[i, j] = 1.0
            a[j, i] = 1.0
        a[np.arange(n_real), np.arange(n_real)] += 1.0  # self loops (real nodes only)
        deg = a.sum(axis=1)
        dinv = np.where(deg > 0, 1.0 / np.sqrt(deg), 0.0)
        a_hat[g] = dinv[:, None] * a * dinv[None, :]
        pool_w[g, :n_real, 0] = 1.0 / n_real
    return jnp.asarray(a_hat), jnp.asarray(pool_w)


def init_params(key):
    ks = jax.random.split(key, 6)
    s = 0.05
    we = s * jax.random.normal(ks[0], (NODE_FEAT, HIDDEN), jnp.float32)       # embed.weight^T
    be = s * jax.random.normal(ks[1], (1, HIDDEN), jnp.float32)               # embed.bias
    wc = s * jax.random.normal(ks[2], (LAYERS, HIDDEN, HIDDEN), jnp.float32)  # conv lin weights^T
    bc = s * jax.random.normal(ks[3], (LAYERS, 1, HIDDEN), jnp.float32)       # conv biases
    wo = s * jax.random.normal(ks[4], (HIDDEN, OUT_DIM), jnp.float32)         # out.weight^T
    bo = s * jax.random.normal(ks[5], (1, OUT_DIM), jnp.float32)              # out.bias
    return we, be, wc, bc, wo, bo


def to_kernel_params(params):
    """Weights -> bf16 (halved DMA bytes, bf16 MXU path); biases stay f32; pad out proj."""
    we, be, wc, bc, wo, bo = params
    wo_pad = jnp.zeros((HIDDEN, OUT_PAD), jnp.float32).at[:, :OUT_DIM].set(wo)
    bo_pad = jnp.zeros((1, OUT_PAD), jnp.float32).at[:, :OUT_DIM].set(bo)
    return (we.astype(jnp.bfloat16), be,
            wc.astype(jnp.bfloat16), bc,
            wo_pad.astype(jnp.bfloat16), bo_pad)


def reference_forward(x_b, a_b, pool_w, params):
    """Pure-JAX reference using the same bf16 operands / f32 accumulation."""
    we, be, wc, bc, wo, bo = params
    h = jnp.einsum('gnf,fh->gnh', x_b, we, preferred_element_type=jnp.float32) + be
    h = jnp.maximum(h, 0.0)
    for l in range(LAYERS):
        hw = jnp.einsum('gnh,hk->gnk', h.astype(jnp.bfloat16), wc[l],
                        preferred_element_type=jnp.float32)
        h = jnp.einsum('gnm,gmk->gnk', a_b, hw.astype(jnp.bfloat16),
                       preferred_element_type=jnp.float32) + bc[l]
        h = jnp.maximum(h, 0.0)
    pooled = jnp.sum(h * pool_w, axis=1)                                      # (G, HIDDEN)
    out = jnp.dot(pooled.astype(jnp.bfloat16), wo,
                  preferred_element_type=jnp.float32) + bo
    return out[:, :OUT_DIM]


if __name__ == "__main__":
    key = jax.random.PRNGKey(0)
    kx, kp = jax.random.split(key)

    # Deterministic batch: 8 graphs padded to 64 nodes each (512 nodes total).
    x = jax.random.normal(kx, (N_GRAPHS, NODES_PER_GRAPH, NODE_FEAT), jnp.float32)
    a_hat, pool_w = build_graph_batch(N_GRAPHS, NODES_PER_GRAPH)   # precomputed off the hot path
    params = to_kernel_params(init_params(kp))

    x_b = x.astype(jnp.bfloat16)
    a_b = a_hat.astype(jnp.bfloat16)

    out = sample_gnn_pallas(x_b, a_b, pool_w, params)
    out = jax.block_until_ready(out)

    ref = reference_forward(x_b, a_b, pool_w, params)
    assert out.shape == (N_GRAPHS, OUT_DIM)
    assert jnp.allclose(out, ref, atol=2e-3, rtol=2e-3), (out, ref)

    print("KERNEL_OK")
</pallas_src>

<mosaic_0001>
module attributes {stable_mosaic.version = 11 : i64} {
  func.func @_gnn_kernel(%arg0: i32, %arg1: memref<1x64x9xbf16, #tpu.memory_space<vmem>>, %arg2: memref<1x64x64xbf16, #tpu.memory_space<vmem>>, %arg3: memref<1x64x1xf32, #tpu.memory_space<vmem>>, %arg4: memref<9x256xbf16, #tpu.memory_space<vmem>>, %arg5: memref<1x256xf32, #tpu.memory_space<vmem>>, %arg6: memref<4x256x256xbf16, #tpu.memory_space<vmem>>, %arg7: memref<4x1x256xf32, #tpu.memory_space<vmem>>, %arg8: memref<256x128xbf16, #tpu.memory_space<vmem>>, %arg9: memref<1x128xf32, #tpu.memory_space<vmem>>, %arg10: memref<1x1x128xf32, #tpu.memory_space<vmem>>) attributes {dimension_semantics = [#tpu.dimension_semantics<parallel>], iteration_bounds = array<i64: 8>, scalar_prefetch = 0 : i64, scratch_operands = 0 : i64, tpu.core_type = #tpu.core_type<tc>, window_params = [{transform_indices = @transform_0, window_bounds = array<i64: 1, 64, 9>}, {transform_indices = @transform_1, window_bounds = array<i64: 1, 64, 64>}, {transform_indices = @transform_2, window_bounds = array<i64: 1, 64, 1>}, {pipeline_mode = #tpu.pipeline_mode<synchronous>, transform_indices = @transform_3, window_bounds = array<i64: 9, 256>}, {pipeline_mode = #tpu.pipeline_mode<synchronous>, transform_indices = @transform_4, window_bounds = array<i64: 1, 256>}, {pipeline_mode = #tpu.pipeline_mode<synchronous>, transform_indices = @transform_5, window_bounds = array<i64: 4, 256, 256>}, {pipeline_mode = #tpu.pipeline_mode<synchronous>, transform_indices = @transform_6, window_bounds = array<i64: 4, 1, 256>}, {pipeline_mode = #tpu.pipeline_mode<synchronous>, transform_indices = @transform_7, window_bounds = array<i64: 256, 128>}, {pipeline_mode = #tpu.pipeline_mode<synchronous>, transform_indices = @transform_8, window_bounds = array<i64: 1, 128>}, {transform_indices = @transform_9, window_bounds = array<i64: 1, 1, 128>}]} {
    %c0 = arith.constant 0 : index
    %c0_0 = arith.constant 0 : index
    %c0_1 = arith.constant 0 : index
    %0 = vector.load %arg1[%c0, %c0_0, %c0_1] : memref<1x64x9xbf16, #tpu.memory_space<vmem>>, vector<1x64x9xbf16>
    %1 = vector.shape_cast %0 : vector<1x64x9xbf16> to vector<64x9xbf16>
    %c0_2 = arith.constant 0 : index
    %c0_3 = arith.constant 0 : index
    %c0_4 = arith.constant 0 : index
    %2 = vector.load %arg2[%c0_2, %c0_3, %c0_4] : memref<1x64x64xbf16, #tpu.memory_space<vmem>>, vector<1x64x64xbf16>
    %3 = vector.shape_cast %2 : vector<1x64x64xbf16> to vector<64x64xbf16>
    %c0_5 = arith.constant 0 : index
    %c0_6 = arith.constant 0 : index
    %c0_7 = arith.constant 0 : index
    %4 = vector.load %arg3[%c0_5, %c0_6, %c0_7] : memref<1x64x1xf32, #tpu.memory_space<vmem>>, vector<1x64x1xf32>
    %5 = vector.shape_cast %4 : vector<1x64x1xf32> to vector<64x1xf32>
    %c0_8 = arith.constant 0 : index
    %c0_9 = arith.constant 0 : index
    %6 = vector.load %arg4[%c0_8, %c0_9] : memref<9x256xbf16, #tpu.memory_space<vmem>>, vector<9x256xbf16>
    %cst = arith.constant dense<0.000000e+00> : vector<64x256xf32>
    %7 = tpu.matmul %1, %6, %cst {dimension_numbers = #tpu.dot_dimension_numbers<[1], [0], [0], [1], [0, 0, 1, 1], [], []>} : vector<64x9xbf16>, vector<9x256xbf16>, vector<64x256xf32> -> vector<64x256xf32>
    %c0_10 = arith.constant 0 : index
    %c0_11 = arith.constant 0 : index
    %8 = vector.load %arg5[%c0_10, %c0_11] : memref<1x256xf32, #tpu.memory_space<vmem>>, vector<1x256xf32>
    %9 = vector.broadcast %8 : vector<1x256xf32> to vector<64x256xf32>
    %10 = arith.addf %7, %9 : vector<64x256xf32>
    %cst_12 = arith.constant 0.000000e+00 : f32
    %11 = vector.broadcast %cst_12 : f32 to vector<64x256xf32>
    %12 = arith.maximumf %10, %11 : vector<64x256xf32>
    %13 = arith.truncf %12 : vector<64x256xf32> to vector<64x256xbf16>
    %c0_13 = arith.constant 0 : index
    %c0_14 = arith.constant 0 : index
    %c0_15 = arith.constant 0 : index
    %14 = vector.load %arg6[%c0_13, %c0_14, %c0_15] : memref<4x256x256xbf16, #tpu.memory_space<vmem>>, vector<1x256x256xbf16>
    %15 = vector.shape_cast %14 : vector<1x256x256xbf16> to vector<256x256xbf16>
    %cst_16 = arith.constant dense<0.000000e+00> : vector<64x256xf32>
    %16 = tpu.matmul %13, %15, %cst_16 {dimension_numbers = #tpu.dot_dimension_numbers<[1], [0], [0], [1], [0, 0, 1, 1], [], []>} : vector<64x256xbf16>, vector<256x256xbf16>, vector<64x256xf32> -> vector<64x256xf32>
    %17 = arith.truncf %16 : vector<64x256xf32> to vector<64x256xbf16>
    %cst_17 = arith.constant dense<0.000000e+00> : vector<64x256xf32>
    %18 = tpu.matmul %3, %17, %cst_17 {dimension_numbers = #tpu.dot_dimension_numbers<[1], [0], [0], [1], [0, 0, 1, 1], [], []>} : vector<64x64xbf16>, vector<64x256xbf16>, vector<64x256xf32> -> vector<64x256xf32>
    %c0_18 = arith.constant 0 : index
    %c0_19 = arith.constant 0 : index
    %c0_20 = arith.constant 0 : index
    %19 = vector.load %arg7[%c0_18, %c0_19, %c0_20] : memref<4x1x256xf32, #tpu.memory_space<vmem>>, vector<1x1x256xf32>
    %20 = vector.shape_cast %19 : vector<1x1x256xf32> to vector<1x256xf32>
    %21 = vector.broadcast %20 : vector<1x256xf32> to vector<64x256xf32>
    %22 = arith.addf %18, %21 : vector<64x256xf32>
    %cst_21 = arith.constant 0.000000e+00 : f32
    %23 = vector.broadcast %cst_21 : f32 to vector<64x256xf32>
    %24 = arith.maximumf %22, %23 : vector<64x256xf32>
    %25 = arith.truncf %24 : vector<64x256xf32> to vector<64x256xbf16>
    %c1 = arith.constant 1 : index
    %c0_22 = arith.constant 0 : index
    %c0_23 = arith.constant 0 : index
    %26 = vector.load %arg6[%c1, %c0_22, %c0_23] : memref<4x256x256xbf16, #tpu.memory_space<vmem>>, vector<1x256x256xbf16>
    %27 = vector.shape_cast %26 : vector<1x256x256xbf16> to vector<256x256xbf16>
    %cst_24 = arith.constant dense<0.000000e+00> : vector<64x256xf32>
    %28 = tpu.matmul %25, %27, %cst_24 {dimension_numbers = #tpu.dot_dimension_numbers<[1], [0], [0], [1], [0, 0, 1, 1], [], []>} : vector<64x256xbf16>, vector<256x256xbf16>, vector<64x256xf32> -> vector<64x256xf32>
    %29 = arith.truncf %28 : vector<64x256xf32> to vector<64x256xbf16>
    %cst_25 = arith.constant dense<0.000000e+00> : vector<64x256xf32>
    %30 = tpu.matmul %3, %29, %cst_25 {dimension_numbers = #tpu.dot_dimension_numbers<[1], [0], [0], [1], [0, 0, 1, 1], [], []>} : vector<64x64xbf16>, vector<64x256xbf16>, vector<64x256xf32> -> vector<64x256xf32>
    %c1_26 = arith.constant 1 : index
    %c0_27 = arith.constant 0 : index
    %c0_28 = arith.constant 0 : index
    %31 = vector.load %arg7[%c1_26, %c0_27, %c0_28] : memref<4x1x256xf32, #tpu.memory_space<vmem>>, vector<1x1x256xf32>
    %32 = vector.shape_cast %31 : vector<1x1x256xf32> to vector<1x256xf32>
    %33 = vector.broadcast %32 : vector<1x256xf32> to vector<64x256xf32>
    %34 = arith.addf %30, %33 : vector<64x256xf32>
    %cst_29 = arith.constant 0.000000e+00 : f32
    %35 = vector.broadcast %cst_29 : f32 to vector<64x256xf32>
    %36 = arith.maximumf %34, %35 : vector<64x256xf32>
    %37 = arith.truncf %36 : vector<64x256xf32> to vector<64x256xbf16>
    %c2 = arith.constant 2 : index
    %c0_30 = arith.constant 0 : index
    %c0_31 = arith.constant 0 : index
    %38 = vector.load %arg6[%c2, %c0_30, %c0_31] : memref<4x256x256xbf16, #tpu.memory_space<vmem>>, vector<1x256x256xbf16>
    %39 = vector.shape_cast %38 : vector<1x256x256xbf16> to vector<256x256xbf16>
    %cst_32 = arith.constant dense<0.000000e+00> : vector<64x256xf32>
    %40 = tpu.matmul %37, %39, %cst_32 {dimension_numbers = #tpu.dot_dimension_numbers<[1], [0], [0], [1], [0, 0, 1, 1], [], []>} : vector<64x256xbf16>, vector<256x256xbf16>, vector<64x256xf32> -> vector<64x256xf32>
    %41 = arith.truncf %40 : vector<64x256xf32> to vector<64x256xbf16>
    %cst_33 = arith.constant dense<0.000000e+00> : vector<64x256xf32>
    %42 = tpu.matmul %3, %41, %cst_33 {dimension_numbers = #tpu.dot_dimension_numbers<[1], [0], [0], [1], [0, 0, 1, 1], [], []>} : vector<64x64xbf16>, vector<64x256xbf16>, vector<64x256xf32> -> vector<64x256xf32>
    %c2_34 = arith.constant 2 : index
    %c0_35 = arith.constant 0 : index
    %c0_36 = arith.constant 0 : index
    %43 = vector.load %arg7[%c2_34, %c0_35, %c0_36] : memref<4x1x256xf32, #tpu.memory_space<vmem>>, vector<1x1x256xf32>
    %44 = vector.shape_cast %43 : vector<1x1x256xf32> to vector<1x256xf32>
    %45 = vector.broadcast %44 : vector<1x256xf32> to vector<64x256xf32>
    %46 = arith.addf %42, %45 : vector<64x256xf32>
    %cst_37 = arith.constant 0.000000e+00 : f32
    %47 = vector.broadcast %cst_37 : f32 to vector<64x256xf32>
    %48 = arith.maximumf %46, %47 : vector<64x256xf32>
    %49 = arith.truncf %48 : vector<64x256xf32> to vector<64x256xbf16>
    %c3 = arith.constant 3 : index
    %c0_38 = arith.constant 0 : index
    %c0_39 = arith.constant 0 : index
    %50 = vector.load %arg6[%c3, %c0_38, %c0_39] : memref<4x256x256xbf16, #tpu.memory_space<vmem>>, vector<1x256x256xbf16>
    %51 = vector.shape_cast %50 : vector<1x256x256xbf16> to vector<256x256xbf16>
    %cst_40 = arith.constant dense<0.000000e+00> : vector<64x256xf32>
    %52 = tpu.matmul %49, %51, %cst_40 {dimension_numbers = #tpu.dot_dimension_numbers<[1], [0], [0], [1], [0, 0, 1, 1], [], []>} : vector<64x256xbf16>, vector<256x256xbf16>, vector<64x256xf32> -> vector<64x256xf32>
    %53 = arith.truncf %52 : vector<64x256xf32> to vector<64x256xbf16>
    %cst_41 = arith.constant dense<0.000000e+00> : vector<64x256xf32>
    %54 = tpu.matmul %3, %53, %cst_41 {dimension_numbers = #tpu.dot_dimension_numbers<[1], [0], [0], [1], [0, 0, 1, 1], [], []>} : vector<64x64xbf16>, vector<64x256xbf16>, vector<64x256xf32> -> vector<64x256xf32>
    %c3_42 = arith.constant 3 : index
    %c0_43 = arith.constant 0 : index
    %c0_44 = arith.constant 0 : index
    %55 = vector.load %arg7[%c3_42, %c0_43, %c0_44] : memref<4x1x256xf32, #tpu.memory_space<vmem>>, vector<1x1x256xf32>
    %56 = vector.shape_cast %55 : vector<1x1x256xf32> to vector<1x256xf32>
    %57 = vector.broadcast %56 : vector<1x256xf32> to vector<64x256xf32>
    %58 = arith.addf %54, %57 : vector<64x256xf32>
    %cst_45 = arith.constant 0.000000e+00 : f32
    %59 = vector.broadcast %cst_45 : f32 to vector<64x256xf32>
    %60 = arith.maximumf %58, %59 : vector<64x256xf32>
    %61 = vector.broadcast %5 : vector<64x1xf32> to vector<64x256xf32>
    %62 = arith.mulf %60, %61 : vector<64x256xf32>
    %cst_46 = arith.constant dense<0.000000e+00> : vector<256xf32>
    %63 = vector.multi_reduction <add>, %62, %cst_46 [0] : vector<64x256xf32> to vector<256xf32>
    %64 = vector.shape_cast %63 : vector<256xf32> to vector<1x256xf32>
    %65 = arith.truncf %64 : vector<1x256xf32> to vector<1x256xbf16>
    %c0_47 = arith.constant 0 : index
    %c0_48 = arith.constant 0 : index
    %66 = vector.load %arg8[%c0_47, %c0_48] : memref<256x128xbf16, #tpu.memory_space<vmem>>, vector<256x128xbf16>
    %cst_49 = arith.constant dense<0.000000e+00> : vector<1x128xf32>
    %67 = tpu.matmul %65, %66, %cst_49 {dimension_numbers = #tpu.dot_dimension_numbers<[1], [0], [0], [1], [0, 0, 1, 1], [], []>} : vector<1x256xbf16>, vector<256x128xbf16>, vector<1x128xf32> -> vector<1x128xf32>
    %c0_50 = arith.constant 0 : index
    %c0_51 = arith.constant 0 : index
    %68 = vector.load %arg9[%c0_50, %c0_51] : memref<1x128xf32, #tpu.memory_space<vmem>>, vector<1x128xf32>
    %69 = arith.addf %67, %68 : vector<1x128xf32>
    %c0_52 = arith.constant 0 : index
    %c0_53 = arith.constant 0 : index
    %c0_54 = arith.constant 0 : index
    %70 = vector.load %arg10[%c0_52, %c0_53, %c0_54] : memref<1x1x128xf32, #tpu.memory_space<vmem>>, vector<1x1x128xf32>
    %71 = vector.shape_cast %70 : vector<1x1x128xf32> to vector<1x128xf32>
    %72 = vector.shape_cast %69 : vector<1x128xf32> to vector<1x1x128xf32>
    tpu.vector_store %arg10[%c0_52, %c0_53, %c0_54], %72 {strides = array<i32>} : memref<1x1x128xf32, #tpu.memory_space<vmem>>, vector<1x1x128xf32>,
    return
  }
  func.func @transform_0(%arg0: i32) -> (i32, i32, i32) {
    %c0_i32 = arith.constant 0 : i32
    %c0_i32_0 = arith.constant 0 : i32
    %c0_i32_1 = arith.constant 0 : i32
    return %arg0, %c0_i32, %c0_i32_0 : i32, i32, i32
  }
  func.func @transform_1(%arg0: i32) -> (i32, i32, i32) {
    %c0_i32 = arith.constant 0 : i32
    %c0_i32_0 = arith.constant 0 : i32
    %c0_i32_1 = arith.constant 0 : i32
    return %arg0, %c0_i32, %c0_i32_0 : i32, i32, i32
  }
  func.func @transform_2(%arg0: i32) -> (i32, i32, i32) {
    %c0_i32 = arith.constant 0 : i32
    %c0_i32_0 = arith.constant 0 : i32
    %c0_i32_1 = arith.constant 0 : i32
    return %arg0, %c0_i32, %c0_i32_0 : i32, i32, i32
  }
  func.func @transform_3(%arg0: i32) -> (i32, i32) {
    %c0_i32 = arith.constant 0 : i32
    %c0_i32_0 = arith.constant 0 : i32
    %c0_i32_1 = arith.constant 0 : i32
    return %c0_i32, %c0_i32_0 : i32, i32
  }
  func.func @transform_4(%arg0: i32) -> (i32, i32) {
    %c0_i32 = arith.constant 0 : i32
    %c0_i32_0 = arith.constant 0 : i32
    %c0_i32_1 = arith.constant 0 : i32
    return %c0_i32, %c0_i32_0 : i32, i32
  }
  func.func @transform_5(%arg0: i32) -> (i32, i32, i32) {
    %c0_i32 = arith.constant 0 : i32
    %c0_i32_0 = arith.constant 0 : i32
    %c0_i32_1 = arith.constant 0 : i32
    %c0_i32_2 = arith.constant 0 : i32
    return %c0_i32, %c0_i32_0, %c0_i32_1 : i32, i32, i32
  }
  func.func @transform_6(%arg0: i32) -> (i32, i32, i32) {
    %c0_i32 = arith.constant 0 : i32
    %c0_i32_0 = arith.constant 0 : i32
    %c0_i32_1 = arith.constant 0 : i32
    %c0_i32_2 = arith.constant 0 : i32
    return %c0_i32, %c0_i32_0, %c0_i32_1 : i32, i32, i32
  }
  func.func @transform_7(%arg0: i32) -> (i32, i32) {
    %c0_i32 = arith.constant 0 : i32
    %c0_i32_0 = arith.constant 0 : i32
    %c0_i32_1 = arith.constant 0 : i32
    return %c0_i32, %c0_i32_0 : i32, i32
  }
  func.func @transform_8(%arg0: i32) -> (i32, i32) {
    %c0_i32 = arith.constant 0 : i32
    %c0_i32_0 = arith.constant 0 : i32
    %c0_i32_1 = arith.constant 0 : i32
    return %c0_i32, %c0_i32_0 : i32, i32
  }
  func.func @transform_9(%arg0: i32) -> (i32, i32, i32) {
    %c0_i32 = arith.constant 0 : i32
    %c0_i32_0 = arith.constant 0 : i32
    %c0_i32_1 = arith.constant 0 : i32
    return %arg0, %c0_i32, %c0_i32_0 : i32, i32, i32
  }
}

</mosaic_0001>

<bundles_post_ra>
// kernel: tpu_custom_call.1
= control target key start
LH: loop header
LB: loop body
LE: loop exit
PB: predicated region body
PF: predicated region fallthrough
CT: control target
= control target key end

     0   :  { %14 = vsyncpa [#allocation3], 0  ;;  %s3469_s0 = inlined_call_operand.vmem [shape: bf16[8,64,9], index: 0, kind: input, shape index: {}]   ;;  %s3470_s1 = inlined_call_operand.vmem [shape: bf16[8,64,64], index: 1, kind: input, shape index: {}]   ;;  %s3471_s2 = inlined_call_operand.vmem [shape: f32[8,64,1], index: 2, kind: input, shape index: {}]   ;;  %s3472_s3 = inlined_call_operand.vmem [shape: bf16[9,256], index: 3, kind: input, shape index: {}]   ;;  %s3473_s4 = inlined_call_operand.vmem [shape: f32[1,256], index: 4, kind: input, shape index: {}]   ;;  %s3474_s5 = inlined_call_operand.hbm [shape: bf16[4,256,256], index: 5, kind: input, shape index: {}]   ;;  %s3475_s6 = inlined_call_operand.vmem [shape: f32[4,1,256], index: 6, kind: input, shape index: {}]   ;;  %s3476_s7 = inlined_call_operand.vmem [shape: bf16[256,128], index: 7, kind: input, shape index: {}]   ;;  %s3477_s8 = inlined_call_operand.vmem [shape: f32[1,128], index: 8, kind: input, shape index: {}]   ;;  %s3478_s9 = inlined_call_operand.hbm [shape: f32[8,1,128], index: 9, kind: output, shape index: {}]  }
   0x1   :  { %15 = vsyncpa [#allocation4], 0 }
   0x2   :  { %17 = vsyncpa [#allocation4 + $0x1], 0  ;;  %s3136_s30 = smov 0   ;;  %s3138_s10 = smov 0  }
   0x3   :  { %s3140_s11 = smov 0   ;;  %s3142_s12 = smov 0  }
   0x4 LB: > { %s3157_s13 = sadd.s32 4294967295, %s3078_s12   ;;  %s2489_s14 = sadd.s32 4294967294, %s3078_s12   ;;  %s3078_s12 = sphi %s3142_s12, %s3494_s12   ;;  %s3074_s11 = sphi %s3140_s11, %s3493_s11   ;;  %s3070_s10 = sphi %s3138_s10, %s3492_s10   ;;  %s3066_s30 = sphi %s3136_s30, %s3491_s30  }
   0x5   : > { %s3161_s15 = sadd.s32 1, %s3078_s12   ;;  %s234_s16 = sadd.s32 1, %s3074_s11 }
   0x6   : > { %s231_s17 = ssub.s32 %s3078_s12, %s3161_s15  ;;  %p244_p0 = scmp.ne.s32.totalorder %s3074_s11, %s3070_s10 }
   0x7   : > { %p232_p1 = scmp.eq.s32.totalorder %s231_s17, 0  ;;  %p245_p2 = scmp.eq.s32.totalorder %s3157_s13, 7 }
   0x8   : > { %p250_p3 = scmp.ne.s32.totalorder %s3070_s10, %s3066_s30  ;;  %p251_p4 = scmp.eq.s32.totalorder %s2489_s14, 7 }
   0x9   : > { %s3172_s18 = scalar_select %p232_p1, %s3074_s11, %s234_s16  }
   0xa   : > { %p3174_p5 = por %p245_p2, %p244_p0  ;;  %p3178_p6 = por %p251_p4, %p250_p3 }
   0xb   : > { %p2490_p7 = scmp.ge.s32.totalorder %s3078_s12, 1  ;;  %p258_p8 = scmp.lt.s32.totalorder %s3078_s12, 9 }
   0xc   : > { %s3482_s19 = scalar_select %p3174_p5, 1, 0 }
   0xd   : > { %s3483_s20 = scalar_select %p3178_p6, 1, 0 }
   0xe   : > { %p3479_p9 = scmp.eq.s32.totalorder %s3157_s13, 0  ;;  %p3185_p10 = pnand %p2490_p7, %p258_p8 }
   0xf   : > { %s3080_s22 = smov [#allocation2]   ;;  %s2984_s27 = scalar_lea.hbm %s3474_s5, 16384 }
  0x10   : > { %s3484_s21 = scalar_select %p3185_p10, 1, 0 }
  0x11   : > { %s276_s23 = sshll.u32 %s3080_s22, 4  ;;  %p2712_p11 = pneg %p3185_p10  ;;  %s277_s23 = int_to_ptr.vmem [resolvable:$true] %s276_s23 }
  0x12   : > { %p2985_p13 = scmp.ne.s32.totalorder %s3474_s5, %s2984_s27  ;;  %p2991_p3 = scmp.lt.u32.totalorder %s2984_s27, %s3474_s5 }
  0x13   : > { %p3193_p12 = pnand %p3479_p9, %p2712_p11 }
  0x15   : > { %p2986_p0 = pneg %p3193_p12 }
  0x17   : > { %p2987_p1 = pnand %p2986_p0, %p2985_p13 }
  0x19   : > { %p2988_p2 = pneg %p2987_p1 }
  0x1b   : > { %p2993_p4 = pnand %p2991_p3, %p2988_p2 }
  0x1d   : > { %2996 = shalt.err (!%p2993_p4)
}
  0x1e   : > { %s2997_s17 = scalar_lea.vmem %s277_s23, 16384  ;;  %p3005_p9 = scmp.lt.s32.totalorder %s277_s23, %s277_s23 }
  0x1f   : > { %p2998_p7 = scmp.ne.s32.totalorder %s277_s23, %s2997_s17  ;;  %p3006_p6 = scmp.lt.s32.totalorder %s2997_s17, %s2997_s17 }
  0x21   : > { %p3000_p8 = pnand %p2998_p7, %p2986_p0  ;;  %p3007_p5 = por %p3006_p6, %p3005_p9 }
  0x23   : > { %p3001_p11 = pneg %p3000_p8 }
  0x25   : > { %p3008_p10 = pnand %p3007_p5, %p3001_p11 }
  0x27   : > { %3011 = shalt.err (!%p3008_p10)
}
  0x28   : > { %s3081_s22 = smov 128   ;;  %s3082_s25 = smov 8  }
  0x29   : > { %2715 = dma.hbm_to_vmem [thread:$0]  (!%p3193_p12), %s3474_s5, 16384, %s277_s23, [#allocation3], %s3081_s22, %s3081_s22, %s3082_s25  }
  0x2a   : > { %p3486_p13 = scmp.ne.s32.totalorder %s3484_s21, 0 }
  0x2b   : > { %p3487_p1 = scmp.eq.s32.totalorder (!%p3486_p13), %s3157_s13, 0 }
  0x2c   : > { %325 = sbr.rel (%p3486_p13) target bundleno = 2422 (0x976), region = 56 }
  0x33   : > { %3057 = dma.done.wait (%p3487_p1), [#allocation3], 16384   ;;  %p3488_p0 = pmov %p3487_p1 }
  0x34   : > { %vm465_vm0 = vcmask 1043456   ;;  %v3083_v0 = vmov 0   ;;  %p370_p5 = scmp.lt.s32.totalorder %s3157_s13, 7  ;;  %vm466_vm1 = vcmask 1044480   ;;  %v3084_v1 = vmov 65535   ;;  %s2678_s27 = sshll.u32 %s3157_s13, 4 }
  0x35   : > { %3059 = vsyncadd (%p3488_p0), [#allocation3], 4294950912  ;;  %507 = vmatprep.mubr.bf16.mxu0 %v3083_v0  ;;  %2760 = vset.pattern.permute.xlu0 %v3083_v0  ;;  %v467_v2 = vsel %vm465_vm0, 4294967295, %v3084_v1  ;;  %v2762_v4 = vld [vmem:[%s3472_s3 + $0x4] ss:$8 sps:$4 sm:$0x1f]   ;;  %v414_v44 = vlaneseq }
  0x36   : > { %2761 = vset.pattern.permute.xlu1 %v3083_v0  ;;  %s3224_s21 = scalar_select %p370_p5, %s3157_s13, 7  ;;  %v468_v3 = vsel %vm466_vm1, %v467_v2, 0  ;;  %v2764_v5 = vld [vmem:[%s3472_s3] ss:$8 sps:$4 sm:$0x1f]   ;;  %vm452_vm2 = vcmask 72704  }
  0x37   : > { %v473_v6 = vand.u32 %v2762_v4, %v468_v3  ;;  %v470_v7 = vand.u32 %v2764_v5, %v468_v3  ;;  %v2769_v9 = vld [vmem:[#allocation2 + $0x4] ss:$8 sps:$4 sm:$0xff]   ;;  %v2771_v10 = vld [vmem:[#allocation2] ss:$8 sps:$4 sm:$0xff]   ;;  %v2772_v11 = vld [vmem:[#allocation2 + $0x14] ss:$8 sps:$4 sm:$0xff]  }
  0x38   : > { %s2681_s23 = sshll.u32 %s3224_s21, 5  ;;  %764 = vmatprep.subr.bf16.mxu1 %v2769_v9  ;;  %v2774_v12 = vld [vmem:[#allocation2 + $0x10] ss:$8 sps:$4 sm:$0xff]   ;;  %v2775_v13 = vld [vmem:[#allocation2 + $0x24] ss:$8 sps:$4 sm:$0xff]   ;;  %v415_v45 = vshrl.u32 %v414_v44, 7 }
  0x39   : > { %s3235_s16 = scalar_lea.vmem %s3469_s0, %s2681_s23  ;;  %475 = vmatprep.subr.bf16.mxu0 %v473_v6  ;;  %765 = vmatpush1.bf16.msra.mxu1 %v2771_v10  ;;  %v2777_v15 = vld [vmem:[#allocation2 + $0x20] ss:$8 sps:$4 sm:$0xff]   ;;  %v2778_v16 = vld [vmem:[#allocation2 + $0x34] ss:$8 sps:$4 sm:$0xff]   ;;  %v2780_v17 = vld [vmem:[#allocation2 + $0x30] ss:$8 sps:$4 sm:$0xff]   ;;  %s3252_s28 = scalar_lea.vmem %s3470_s1, %s2681_s23 }
  0x3a   : > { %v2765_v8 = vld [vmem:[%s3235_s16] sm:$0xff]   ;;  %476 = vmatpush1.bf16.msra.mxu0 %v470_v7  ;;  %766 = vmatprep.subr.bf16.mxu1 %v2772_v11  ;;  %v2766_v14 = vld [vmem:[%s3235_s16 + $0x8] sm:$0xff]   ;;  %v2767_v19 = vld [vmem:[%s3235_s16 + $0x10] sm:$0xff]   ;;  %v3259_v46 = vsub.s32 0, %v415_v45  ;;  %v3264_v48 = vsub.s32 1, %v415_v45  ;;  %vm877_vm3 = vcmask 523264  }
  0x3b   : > { %v2781_v18 = vld [vmem:[#allocation2 + $0x44] ss:$8 sps:$4 sm:$0xff]   ;;  %v2783_v20 = vld [vmem:[#allocation2 + $0x40] ss:$8 sps:$4 sm:$0xff]   ;;  %v2784_v21 = vld [vmem:[#allocation2 + $0x54] ss:$8 sps:$4 sm:$0xff]  }
  0x3c   : > { %v2786_v22 = vld [vmem:[#allocation2 + $0x50] ss:$8 sps:$4 sm:$0xff]   ;;  %v2787_v23 = vld [vmem:[#allocation2 + $0x64] ss:$8 sps:$4 sm:$0xff]   ;;  %v2789_v25 = vld [vmem:[#allocation2 + $0x60] ss:$8 sps:$4 sm:$0xff]  }
  0x3d   : > { %2507 = vmatmul.mubr.msk.bf16.vlgmr.msra.gmra.mrb[0].mxu0 %vm452_vm2, %v2765_v8  ;;  %767 = vmatpush1.bf16.msra.mxu1 %v2774_v12  ;;  %v2768_v24 = vld [vmem:[%s3235_s16 + $0x18] sm:$0xff]   ;;  %v2793_v28 = vld [vmem:[#allocation2 + $0x84] ss:$8 sps:$4 sm:$0xff]   ;;  %v2795_v29 = vld [vmem:[#allocation2 + $0x80] ss:$8 sps:$4 sm:$0xff]   ;;  %s2683_s25 = sshll.u32 %s3224_s21, 6 }
  0x3e   : > { %517 = vmatprep.mubr.bf16.mxu0 %v3083_v0  ;;  %768 = vmatprep.subr.bf16.mxu1 %v2775_v13  ;;  %v2790_v26 = vld [vmem:[#allocation2 + $0x74] ss:$8 sps:$4 sm:$0xff]   ;;  %v2792_v27 = vld [vmem:[#allocation2 + $0x70] ss:$8 sps:$4 sm:$0xff]   ;;  %v2799_v32 = vld [vmem:[#allocation2 + $0xa4] ss:$8 sps:$4 sm:$0xff]   ;;  %s384_s24 = scalar_lea.vmem %s3471_s2, %s2683_s25 }
  0x3f   : > { %v2796_v30 = vld [vmem:[#allocation2 + $0x94] ss:$8 sps:$4 sm:$0xff]   ;;  %v2798_v31 = vld [vmem:[#allocation2 + $0x90] ss:$8 sps:$4 sm:$0xff]   ;;  %v2801_v33 = vld [vmem:[#allocation2 + $0xa0] ss:$8 sps:$4 sm:$0xff]  }
  0x40   : > { %v2802_v34 = vld [vmem:[#allocation2 + $0xb4] ss:$8 sps:$4 sm:$0xff]   ;;  %v2804_v35 = vld [vmem:[#allocation2 + $0xb0] ss:$8 sps:$4 sm:$0xff]   ;;  %v2805_v36 = vld [vmem:[#allocation2 + $0xc4] ss:$8 sps:$4 sm:$0xff]  }
  0x41   : > { %769 = vmatpush1.bf16.msra.mxu1 %v2777_v15  ;;  %v2807_v37 = vld [vmem:[#allocation2 + $0xc0] ss:$8 sps:$4 sm:$0xff]   ;;  %v2808_v38 = vld [vmem:[#allocation2 + $0xd4] ss:$8 sps:$4 sm:$0xff]   ;;  %v2810_v39 = vld [vmem:[#allocation2 + $0xd0] ss:$8 sps:$4 sm:$0xff]  }
  0x42   : > { %770 = vmatprep.subr.bf16.mxu1 %v2778_v16  ;;  %v2811_v40 = vld [vmem:[#allocation2 + $0xe4] ss:$8 sps:$4 sm:$0xff]   ;;  %v2813_v41 = vld [vmem:[#allocation2 + $0xe0] ss:$8 sps:$4 sm:$0xff]   ;;  %v2814_v42 = vld [vmem:[#allocation2 + $0xf4] ss:$8 sps:$4 sm:$0xff]  }
  0x43   : > { %v2816_v43 = vld [vmem:[#allocation2 + $0xf0] ss:$8 sps:$4 sm:$0xff]   ;;  %v412_v47 = vld [vmem:[%s3473_s4] sm:$0x3]  ;;  %s368_s23 = sand.u32 1, %s3070_s10   ;;  %p3489_p9 = scmp.ne.s32.totalorder %s3482_s19, 0 }
  0x44   : > { %v417_v49 = vrot.slane %v412_v47, %v3259_v46  ;;  %v421_v50 = vrot.slane %v412_v47, %v3264_v48  ;;  %s369_s29 = scalar_lea.vmem [#allocation5], %s368_s23  ;;  %s2386_s22 = scalar_lea.sflag [#allocation4], %s368_s23 }
  0x45   : > { %2508 = vmatmul.mubr.msk.bf16.gmra.mrb[4].mxu0 %vm452_vm2, %v2766_v14  ;;  %771 = vmatpush1.bf16.msra.mxu1 %v2780_v17  ;;  %s2398_s14 = sshll.u32 %s369_s29, 4  ;;  %s3085_s13 = smov [#allocation5]   ;;  %s3429_s14 = int_to_ptr.vmem [resolvable:$true] %s2398_s14 }
  0x46   : > { %527 = vmatprep.mubr.bf16.mxu0 %v3083_v0  ;;  %772 = vmatprep.subr.bf16.mxu1 %v2781_v18  ;;  %s3012_s25 = scalar_lea.vmem %s3429_s14, 16  ;;  %s3016_s26 = sshll.u32 %s3085_s13, 4  ;;  %s3017_s26 = int_to_ptr.vmem [resolvable:$false] %s3016_s26 }
  0x47   : > { %p3013_p6 = scmp.ne.s32.totalorder %s3429_s14, %s3012_s25  ;;  %p3019_p2 = scmp.lt.s32.totalorder %s3429_s14, %s3017_s26 }
  0x49   : > { %773 = vmatpush1.bf16.msra.mxu1 %v2783_v20  ;;  %p3014_p10 = pnand %p3013_p6, %p3489_p9 }
  0x4a   : > { %774 = vmatprep.subr.bf16.mxu1 %v2784_v21 }
  0x4b   : > { %p3015_p12 = pneg %p3014_p10 }
  0x4d   : > { %2509 = vmatmul.mubr.msk.bf16.gmra.mrb[8].mxu0 %vm452_vm2, %v2767_v19  ;;  %775 = vmatpush1.bf16.msra.mxu1 %v2786_v22 }
  0x4e   : > { %537 = vmatprep.mubr.bf16.mxu0 %v3083_v0  ;;  %776 = vmatprep.subr.bf16.mxu1 %v2787_v23 }
  0x51   : > { %777 = vmatpush1.bf16.msra.mxu1 %v2789_v25 }
  0x52   : > { %778 = vmatprep.subr.bf16.mxu1 %v2790_v26 }
  0x55   : > { %2510 = vmatmul.mubr.msk.bf16.gmra.mrb[12].mxu0 %vm452_vm2, %v2768_v24  ;;  %779 = vmatpush1.bf16.msra.mxu1 %v2792_v27 }
  0x56   : > { %922 = vmatprep.mubr.bf16.mxu0 %v3083_v0  ;;  %780 = vmatprep.subr.bf16.mxu1 %v2793_v28 }
  0x59   : > { %781 = vmatpush1.bf16.msra.mxu1 %v2795_v29 }
  0x5a   : > { %782 = vmatprep.subr.bf16.mxu1 %v2796_v30 }
  0x5d   : > { %783 = vmatpush1.bf16.msra.mxu1 %v2798_v31 }
  0x5e   : > { %784 = vmatprep.subr.bf16.mxu1 %v2799_v32 }
  0x61   : > { %785 = vmatpush1.bf16.msra.mxu1 %v2801_v33 }
  0x62   : > { %786 = vmatprep.subr.bf16.mxu1 %v2802_v34 }
  0x65   : > { %787 = vmatpush1.bf16.msra.mxu1 %v2804_v35 }
  0x66   : > { %788 = vmatprep.subr.bf16.mxu1 %v2805_v36 }
  0x69   : > { %789 = vmatpush1.bf16.msra.mxu1 %v2807_v37 }
  0x6a   : > { %790 = vmatprep.subr.bf16.mxu1 %v2808_v38 }
  0x6d   : > { %791 = vmatpush1.bf16.msra.mxu1 %v2810_v39 }
  0x6e   : > { %792 = vmatprep.subr.bf16.mxu1 %v2811_v40 }
  0x71   : > { %793 = vmatpush1.bf16.msra.mxu1 %v2813_v41 }
  0x72   : > { %794 = vmatprep.subr.bf16.mxu1 %v2814_v42 }
  0x75   : > { %795 = vmatpush1.bf16.msra.mxu1 %v2816_v43 }
 0x110   : > { %v509_v51 = vpop.f32.mrb[0].mxu0 }
 0x111   : > { %v510_v52 = vadd.f32 %v509_v51, %v417_v49  ;;  %v511_v53 = vpop.f32.mrb[1].mxu0 }
 0x112   : > { %v512_v54 = vadd.f32 %v511_v53, %v421_v50  ;;  %v513_v55 = vpop.f32.mrb[2].mxu0 }
 0x113   : > { %v514_v56 = vadd.f32 %v513_v55, %v417_v49  ;;  %v515_v57 = vpop.f32.mrb[3].mxu0  ;;  %v548_v59 = vmax.f32 %v510_v52, 0.0 }
 0x114   : > { %v516_v58 = vadd.f32 %v515_v57, %v421_v50  ;;  %v549_v61 = vmax.f32 %v512_v54, 0.0 }
 0x115   : > { %v550_v60 = vmax.f32 %v514_v56, 0.0 }
 0x116   : > { %v551_v62 = vmax.f32 %v516_v58, 0.0 }
 0x117   : > { %v564_v63 = vpack.c.bf16 %v550_v60, %v548_v59 }
 0x118   : > { %v519_v1 = vpop.f32.mrb[4].mxu0  ;;  %v565_v2 = vpack.c.bf16 %v551_v62, %v549_v61 }
 0x119   : > { %v520_v3 = vadd.f32 %v519_v1, %v417_v49  ;;  %v521_v4 = vpop.f32.mrb[5].mxu0 }
 0x11a   : > { %v522_v5 = vadd.f32 %v521_v4, %v421_v50  ;;  %v523_v6 = vpop.f32.mrb[6].mxu0  ;;  %796 = vmatprep.mubr.bf16.mxu1 %v565_v2 }
 0x11b   : > { %v524_v7 = vadd.f32 %v523_v6, %v417_v49  ;;  %v525_v8 = vpop.f32.mrb[7].mxu0  ;;  %797 = vmatmul.mubr.bf16.vlgmr.msra.gmra.mrb[0].mxu1 %v564_v63  ;;  %v552_v10 = vmax.f32 %v520_v3, 0.0 }
 0x11c   : > { %v526_v9 = vadd.f32 %v525_v8, %v421_v50  ;;  %v553_v12 = vmax.f32 %v522_v5, 0.0  ;;  %v3270_v8 = vld [vmem:[%s3252_s28] sm:$0xff]  }
 0x11d   : > { %v554_v11 = vmax.f32 %v524_v7, 0.0  ;;  %v2823_v7 = vld [vmem:[#allocation2 + $0x104] ss:$8 sps:$4 sm:$0xff]  }
 0x11e   : > { %v555_v13 = vmax.f32 %v526_v9, 0.0  ;;  %v2821_v9 = vld [vmem:[#allocation2 + $0x100] ss:$8 sps:$4 sm:$0xff]  }
 0x11f   : > { %v566_v14 = vpack.c.bf16 %v554_v11, %v552_v10  ;;  %v2826_v10 = vld [vmem:[#allocation2 + $0x114] ss:$8 sps:$4 sm:$0xff]   ;;  %v2824_v11 = vld [vmem:[#allocation2 + $0x110] ss:$8 sps:$4 sm:$0xff]  }
 0x120   : > { %v567_v15 = vpack.c.bf16 %v555_v13, %v553_v12  ;;  %v529_v16 = vpop.f32.mrb[8].mxu0  ;;  %v2829_v12 = vld [vmem:[#allocation2 + $0x124] ss:$8 sps:$4 sm:$0xff]  }
 0x121   : > { %v530_v17 = vadd.f32 %v529_v16, %v417_v49  ;;  %v531_v18 = vpop.f32.mrb[9].mxu0  ;;  %v3276_v13 = vld [vmem:[%s3252_s28 + $0x8] sm:$0xff]   ;;  %v2830_v16 = vld [vmem:[#allocation2 + $0x130] ss:$8 sps:$4 sm:$0xff]  }
 0x122   : > { %v532_v19 = vadd.f32 %v531_v18, %v421_v50  ;;  %v533_v20 = vpop.f32.mrb[10].mxu0  ;;  %806 = vmatprep.mubr.bf16.mxu1 %v567_v15  ;;  %v2832_v15 = vld [vmem:[#allocation2 + $0x134] ss:$8 sps:$4 sm:$0xff]  }
 0x123   : > { %v534_v21 = vadd.f32 %v533_v20, %v417_v49  ;;  %v535_v22 = vpop.f32.mrb[11].mxu0  ;;  %807 = vmatmul.mubr.bf16.gmra.mrb[4].mxu1 %v566_v14  ;;  %v556_v24 = vmax.f32 %v530_v17, 0.0  ;;  %v2827_v14 = vld [vmem:[#allocation2 + $0x120] ss:$8 sps:$4 sm:$0xff]   ;;  %v2835_v17 = vld [vmem:[#allocation2 + $0x144] ss:$8 sps:$4 sm:$0xff]  }
 0x124   : > { %v536_v23 = vadd.f32 %v535_v22, %v421_v50  ;;  %v557_v26 = vmax.f32 %v532_v19, 0.0  ;;  %v3282_v18 = vld [vmem:[%s3252_s28 + $0x10] sm:$0xff]   ;;  %v2833_v19 = vld [vmem:[#allocation2 + $0x140] ss:$8 sps:$4 sm:$0xff]   ;;  %v2841_v22 = vld [vmem:[#allocation2 + $0x164] ss:$8 sps:$4 sm:$0xff]  }
 0x125   : > { %v558_v25 = vmax.f32 %v534_v21, 0.0  ;;  %v2838_v20 = vld [vmem:[#allocation2 + $0x154] ss:$8 sps:$4 sm:$0xff]   ;;  %v2836_v21 = vld [vmem:[#allocation2 + $0x150] ss:$8 sps:$4 sm:$0xff]  }
 0x126   : > { %v559_v27 = vmax.f32 %v536_v23, 0.0  ;;  %v3288_v23 = vld [vmem:[%s3252_s28 + $0x18] sm:$0xff]  }
 0x127   : > { %v568_v28 = vpack.c.bf16 %v558_v25, %v556_v24  ;;  %v2839_v24 = vld [vmem:[#allocation2 + $0x160] ss:$8 sps:$4 sm:$0xff]   ;;  %v2844_v25 = vld [vmem:[#allocation2 + $0x174] ss:$8 sps:$4 sm:$0xff]  }
 0x128   : > { %v569_v29 = vpack.c.bf16 %v559_v27, %v557_v26  ;;  %v539_v30 = vpop.f32.mrb[12].mxu0  ;;  %v2842_v26 = vld [vmem:[#allocation2 + $0x170] ss:$8 sps:$4 sm:$0xff]   ;;  %v2847_v27 = vld [vmem:[#allocation2 + $0x184] ss:$8 sps:$4 sm:$0xff]  }
 0x129   : > { %v540_v31 = vadd.f32 %v539_v30, %v417_v49  ;;  %v541_v32 = vpop.f32.mrb[13].mxu0  ;;  %v2848_v30 = vld [vmem:[#allocation2 + $0x190] ss:$8 sps:$4 sm:$0xff]  }
 0x12a   : > { %v542_v33 = vadd.f32 %v541_v32, %v421_v50  ;;  %v543_v34 = vpop.f32.mrb[14].mxu0  ;;  %816 = vmatprep.mubr.bf16.mxu1 %v569_v29  ;;  %v2850_v29 = vld [vmem:[#allocation2 + $0x194] ss:$8 sps:$4 sm:$0xff]   ;;  %v2851_v32 = vld [vmem:[#allocation2 + $0x1a0] ss:$8 sps:$4 sm:$0xff]  }
 0x12b   : > { %v544_v35 = vadd.f32 %v543_v34, %v417_v49  ;;  %v545_v36 = vpop.f32.mrb[15].mxu0  ;;  %817 = vmatmul.mubr.bf16.gmra.mrb[8].mxu1 %v568_v28  ;;  %v560_v38 = vmax.f32 %v540_v31, 0.0  ;;  %v2845_v28 = vld [vmem:[#allocation2 + $0x180] ss:$8 sps:$4 sm:$0xff]   ;;  %v2853_v31 = vld [vmem:[#allocation2 + $0x1a4] ss:$8 sps:$4 sm:$0xff]  }
 0x12c   : > { %v546_v37 = vadd.f32 %v545_v36, %v421_v50  ;;  %v561_v40 = vmax.f32 %v542_v33, 0.0  ;;  %v2856_v33 = vld [vmem:[#allocation2 + $0x1b4] ss:$8 sps:$4 sm:$0xff]   ;;  %v2854_v34 = vld [vmem:[#allocation2 + $0x1b0] ss:$8 sps:$4 sm:$0xff]  }
 0x12d   : > { %v562_v39 = vmax.f32 %v544_v35, 0.0  ;;  %v2859_v35 = vld [vmem:[#allocation2 + $0x1c4] ss:$8 sps:$4 sm:$0xff]   ;;  %v2857_v36 = vld [vmem:[#allocation2 + $0x1c0] ss:$8 sps:$4 sm:$0xff]  }
 0x12e   : > { %v563_v41 = vmax.f32 %v546_v37, 0.0  ;;  %v2862_v37 = vld [vmem:[#allocation2 + $0x1d4] ss:$8 sps:$4 sm:$0xff]  }
 0x12f   : > { %v570_v42 = vpack.c.bf16 %v562_v39, %v560_v38  ;;  %v2860_v38 = vld [vmem:[#allocation2 + $0x1d0] ss:$8 sps:$4 sm:$0xff]   ;;  %v2865_v39 = vld [vmem:[#allocation2 + $0x1e4] ss:$8 sps:$4 sm:$0xff]  }
 0x130   : > { %v571_v43 = vpack.c.bf16 %v563_v41, %v561_v40  ;;  %v2863_v40 = vld [vmem:[#allocation2 + $0x1e0] ss:$8 sps:$4 sm:$0xff]   ;;  %v2868_v41 = vld [vmem:[#allocation2 + $0x1f4] ss:$8 sps:$4 sm:$0xff]  }
 0x132   : > { %826 = vmatprep.mubr.bf16.mxu1 %v571_v43  ;;  %v845_v43 = vld [vmem:[%s3475_s6] sm:$0x3] }
 0x133   : > { %827 = vmatmul.mubr.bf16.gmra.mrb[12].mxu1 %v570_v42  ;;  %v2866_v42 = vld [vmem:[#allocation2 + $0x1f0] ss:$8 sps:$4 sm:$0xff]  }
 0x134   : > { %1306 = vmatprep.mubr.bf16.mxu1 %v3083_v0 }
 0x1ee   : > { %v798_v44 = vpop.f32.mrb[0].mxu1 }
 0x1ef   : > { %v800_v45 = vpop.f32.mrb[1].mxu1 }
 0x1f0   : > { %v802_v47 = vpop.f32.mrb[2].mxu1 }
 0x1f1   : > { %v837_v51 = vpack.c.bf16 %v802_v47, %v798_v44  ;;  %v804_v52 = vpop.f32.mrb[3].mxu1  ;;  %v850_v44 = vrot.slane %v845_v43, %v3259_v46 }
 0x1f2   : > { %v838_v53 = vpack.c.bf16 %v804_v52, %v800_v45  ;;  %v854_v45 = vrot.slane %v845_v43, %v3264_v48 }
 0x1f4   : > { %890 = vmatprep.subr.bf16.mxu0 %v838_v53 }
 0x1f5   : > { %891 = vmatpush1.bf16.msra.mxu0 %v837_v51 }
 0x1f6   : > { %v808_v49 = vpop.f32.mrb[4].mxu1 }
 0x1f7   : > { %v810_v50 = vpop.f32.mrb[5].mxu1 }
 0x1f8   : > { %v812_v54 = vpop.f32.mrb[6].mxu1 }
 0x1f9   : > { %v839_v55 = vpack.c.bf16 %v812_v54, %v808_v49  ;;  %v814_v56 = vpop.f32.mrb[7].mxu1 }
 0x1fa   : > { %v840_v57 = vpack.c.bf16 %v814_v56, %v810_v50 }
 0x1fc   : > { %892 = vmatprep.subr.bf16.mxu0 %v840_v57 }
 0x1fd   : > { %893 = vmatpush1.bf16.msra.mxu0 %v839_v55 }
 0x1fe   : > { %v818_v58 = vpop.f32.mrb[8].mxu1 }
 0x1ff   : > { %v820_v59 = vpop.f32.mrb[9].mxu1 }
 0x200   : > { %v822_v60 = vpop.f32.mrb[10].mxu1 }
 0x201   : > { %v841_v61 = vpack.c.bf16 %v822_v60, %v818_v58  ;;  %v824_v62 = vpop.f32.mrb[11].mxu1 }
 0x202   : > { %v842_v63 = vpack.c.bf16 %v824_v62, %v820_v59 }
 0x204   : > { %894 = vmatprep.subr.bf16.mxu0 %v842_v63 }
 0x205   : > { %895 = vmatpush1.bf16.msra.mxu0 %v841_v61 }
 0x206   : > { %v828_v1 = vpop.f32.mrb[12].mxu1 }
 0x207   : > { %v830_v2 = vpop.f32.mrb[13].mxu1 }
 0x208   : > { %v832_v3 = vpop.f32.mrb[14].mxu1 }
 0x209   : > { %v843_v4 = vpack.c.bf16 %v832_v3, %v828_v1  ;;  %v834_v5 = vpop.f32.mrb[15].mxu1 }
 0x20a   : > { %v844_v6 = vpack.c.bf16 %v834_v5, %v830_v2 }
 0x20c   : > { %896 = vmatprep.subr.bf16.mxu0 %v844_v6 }
 0x20d   : > { %897 = vmatpush1.bf16.msra.mxu0 %v843_v4 }
 0x20e   : > { %1180 = vmatprep.subr.bf16.mxu0 %v2823_v7 }
 0x210   : > { %2547 = vmatmul.mubr.msk.bf16.vlgmr.msra.gmra.mrb[16].mxu0 %vm877_vm3, %v3270_v8 }
 0x211   : > { %932 = vmatprep.mubr.bf16.mxu0 %v3083_v0  ;;  %1181 = vmatpush1.bf16.msra.mxu0 %v2821_v9 }
 0x212   : > { %1182 = vmatprep.subr.bf16.mxu0 %v2826_v10 }
 0x215   : > { %1183 = vmatpush1.bf16.msra.mxu0 %v2824_v11 }
 0x216   : > { %1184 = vmatprep.subr.bf16.mxu0 %v2829_v12 }
 0x218   : > { %2548 = vmatmul.mubr.msk.bf16.gmra.mrb[20].mxu0 %vm877_vm3, %v3276_v13 }
 0x219   : > { %942 = vmatprep.mubr.bf16.mxu0 %v3083_v0  ;;  %1185 = vmatpush1.bf16.msra.mxu0 %v2827_v14 }
 0x21a   : > { %1186 = vmatprep.subr.bf16.mxu0 %v2832_v15 }
 0x21d   : > { %1187 = vmatpush1.bf16.msra.mxu0 %v2830_v16 }
 0x21e   : > { %1188 = vmatprep.subr.bf16.mxu0 %v2835_v17 }
 0x220   : > { %2549 = vmatmul.mubr.msk.bf16.gmra.mrb[24].mxu0 %vm877_vm3, %v3282_v18 }
 0x221   : > { %952 = vmatprep.mubr.bf16.mxu0 %v3083_v0  ;;  %1189 = vmatpush1.bf16.msra.mxu0 %v2833_v19 }
 0x222   : > { %1190 = vmatprep.subr.bf16.mxu0 %v2838_v20 }
 0x225   : > { %1191 = vmatpush1.bf16.msra.mxu0 %v2836_v21 }
 0x226   : > { %1192 = vmatprep.subr.bf16.mxu0 %v2841_v22 }
 0x228   : > { %2550 = vmatmul.mubr.msk.bf16.gmra.mrb[28].mxu0 %vm877_vm3, %v3288_v23 }
 0x229   : > { %1193 = vmatpush1.bf16.msra.mxu0 %v2839_v24 }
 0x22a   : > { %1194 = vmatprep.subr.bf16.mxu0 %v2844_v25 }
 0x22d   : > { %1195 = vmatpush1.bf16.msra.mxu0 %v2842_v26 }
 0x22e   : > { %1196 = vmatprep.subr.bf16.mxu0 %v2847_v27 }
 0x231   : > { %1197 = vmatpush1.bf16.msra.mxu0 %v2845_v28 }
 0x232   : > { %1198 = vmatprep.subr.bf16.mxu0 %v2850_v29 }
 0x235   : > { %1199 = vmatpush1.bf16.msra.mxu0 %v2848_v30 }
 0x236   : > { %1200 = vmatprep.subr.bf16.mxu0 %v2853_v31 }
 0x239   : > { %1201 = vmatpush1.bf16.msra.mxu0 %v2851_v32 }
 0x23a   : > { %1202 = vmatprep.subr.bf16.mxu0 %v2856_v33 }
 0x23d   : > { %1203 = vmatpush1.bf16.msra.mxu0 %v2854_v34 }
 0x23e   : > { %1204 = vmatprep.subr.bf16.mxu0 %v2859_v35 }
 0x241   : > { %1205 = vmatpush1.bf16.msra.mxu0 %v2857_v36 }
 0x242   : > { %1206 = vmatprep.subr.bf16.mxu0 %v2862_v37 }
 0x245   : > { %1207 = vmatpush1.bf16.msra.mxu0 %v2860_v38 }
 0x246   : > { %1208 = vmatprep.subr.bf16.mxu0 %v2865_v39 }
 0x249   : > { %1209 = vmatpush1.bf16.msra.mxu0 %v2863_v40 }
 0x24a   : > { %1210 = vmatprep.subr.bf16.mxu0 %v2868_v41 }
 0x24d   : > { %1211 = vmatpush1.bf16.msra.mxu0 %v2866_v42 }
 0x2e3   : > { %v924_v47 = vpop.f32.mrb[16].mxu0 }
 0x2e4   : > { %v925_v51 = vadd.f32 %v924_v47, %v850_v44  ;;  %v926_v52 = vpop.f32.mrb[17].mxu0 }
 0x2e5   : > { %v927_v53 = vadd.f32 %v926_v52, %v854_v45  ;;  %v928_v49 = vpop.f32.mrb[18].mxu0 }
 0x2e6   : > { %v929_v50 = vadd.f32 %v928_v49, %v850_v44  ;;  %v930_v54 = vpop.f32.mrb[19].mxu0  ;;  %v963_v56 = vmax.f32 %v925_v51, 0.0 }
 0x2e7   : > { %v931_v55 = vadd.f32 %v930_v54, %v854_v45  ;;  %v964_v58 = vmax.f32 %v927_v53, 0.0 }
 0x2e8   : > { %v965_v57 = vmax.f32 %v929_v50, 0.0 }
 0x2e9   : > { %v966_v59 = vmax.f32 %v931_v55, 0.0 }
 0x2ea   : > { %v979_v60 = vpack.c.bf16 %v965_v57, %v963_v56 }
 0x2eb   : > { %v980_v61 = vpack.c.bf16 %v966_v59, %v964_v58  ;;  %v934_v62 = vpop.f32.mrb[20].mxu0 }
 0x2ec   : > { %v935_v63 = vadd.f32 %v934_v62, %v850_v44  ;;  %v936_v1 = vpop.f32.mrb[21].mxu0 }
 0x2ed   : > { %v937_v2 = vadd.f32 %v936_v1, %v854_v45  ;;  %v938_v3 = vpop.f32.mrb[22].mxu0  ;;  %1212 = vmatprep.mubr.bf16.mxu0 %v980_v61 }
 0x2ee   : > { %v939_v4 = vadd.f32 %v938_v3, %v850_v44  ;;  %v940_v5 = vpop.f32.mrb[23].mxu0  ;;  %1213 = vmatmul.mubr.bf16.vlgmr.msra.gmra.mrb[32].mxu0 %v979_v60  ;;  %v967_v7 = vmax.f32 %v935_v63, 0.0 }
 0x2ef   : > { %v941_v6 = vadd.f32 %v940_v5, %v854_v45  ;;  %v968_v10 = vmax.f32 %v937_v2, 0.0 }
 0x2f0   : > { %v969_v9 = vmax.f32 %v939_v4, 0.0 }
 0x2f1   : > { %v970_v11 = vmax.f32 %v941_v6, 0.0 }
 0x2f2   : > { %v981_v12 = vpack.c.bf16 %v969_v9, %v967_v7  ;;  %v2871_v9 = vld [vmem:[#allocation2 + $0x204] ss:$8 sps:$4 sm:$0xff]  }
 0x2f3   : > { %v982_v14 = vpack.c.bf16 %v970_v11, %v968_v10  ;;  %v944_v15 = vpop.f32.mrb[24].mxu0  ;;  %v2869_v10 = vld [vmem:[#allocation2 + $0x200] ss:$8 sps:$4 sm:$0xff]   ;;  %v2874_v11 = vld [vmem:[#allocation2 + $0x214] ss:$8 sps:$4 sm:$0xff]  }
 0x2f4   : > { %v945_v16 = vadd.f32 %v944_v15, %v850_v44  ;;  %v946_v17 = vpop.f32.mrb[25].mxu0  ;;  %v2875_v15 = vld [vmem:[#allocation2 + $0x220] ss:$8 sps:$4 sm:$0xff]  }
 0x2f5   : > { %v947_v19 = vadd.f32 %v946_v17, %v854_v45  ;;  %v948_v20 = vpop.f32.mrb[26].mxu0  ;;  %1222 = vmatprep.mubr.bf16.mxu0 %v982_v14  ;;  %v2877_v14 = vld [vmem:[#allocation2 + $0x224] ss:$8 sps:$4 sm:$0xff]   ;;  %v2878_v17 = vld [vmem:[#allocation2 + $0x230] ss:$8 sps:$4 sm:$0xff]  }
 0x2f6   : > { %v949_v21 = vadd.f32 %v948_v20, %v850_v44  ;;  %v950_v22 = vpop.f32.mrb[27].mxu0  ;;  %1223 = vmatmul.mubr.bf16.gmra.mrb[36].mxu0 %v981_v12  ;;  %v971_v25 = vmax.f32 %v945_v16, 0.0  ;;  %v2872_v12 = vld [vmem:[#allocation2 + $0x210] ss:$8 sps:$4 sm:$0xff]   ;;  %v2880_v16 = vld [vmem:[#allocation2 + $0x234] ss:$8 sps:$4 sm:$0xff]  }
 0x2f7   : > { %v951_v24 = vadd.f32 %v950_v22, %v854_v45  ;;  %v972_v27 = vmax.f32 %v947_v19, 0.0  ;;  %v2883_v19 = vld [vmem:[#allocation2 + $0x244] ss:$8 sps:$4 sm:$0xff]   ;;  %v2881_v20 = vld [vmem:[#allocation2 + $0x240] ss:$8 sps:$4 sm:$0xff]  }
 0x2f8   : > { %v973_v26 = vmax.f32 %v949_v21, 0.0  ;;  %v2886_v21 = vld [vmem:[#allocation2 + $0x254] ss:$8 sps:$4 sm:$0xff]   ;;  %v2884_v22 = vld [vmem:[#allocation2 + $0x250] ss:$8 sps:$4 sm:$0xff]  }
 0x2f9   : > { %v974_v28 = vmax.f32 %v951_v24, 0.0  ;;  %v2889_v24 = vld [vmem:[#allocation2 + $0x264] ss:$8 sps:$4 sm:$0xff]  }
 0x2fa   : > { %v983_v29 = vpack.c.bf16 %v973_v26, %v971_v25  ;;  %v2887_v25 = vld [vmem:[#allocation2 + $0x260] ss:$8 sps:$4 sm:$0xff]   ;;  %v2892_v26 = vld [vmem:[#allocation2 + $0x274] ss:$8 sps:$4 sm:$0xff]  }
 0x2fb   : > { %v984_v30 = vpack.c.bf16 %v974_v28, %v972_v27  ;;  %v954_v31 = vpop.f32.mrb[28].mxu0  ;;  %v2890_v27 = vld [vmem:[#allocation2 + $0x270] ss:$8 sps:$4 sm:$0xff]   ;;  %v2895_v28 = vld [vmem:[#allocation2 + $0x284] ss:$8 sps:$4 sm:$0xff]  }
 0x2fc   : > { %v955_v32 = vadd.f32 %v954_v31, %v850_v44  ;;  %v956_v33 = vpop.f32.mrb[29].mxu0  ;;  %v2896_v31 = vld [vmem:[#allocation2 + $0x290] ss:$8 sps:$4 sm:$0xff]  }
 0x2fd   : > { %v957_v34 = vadd.f32 %v956_v33, %v854_v45  ;;  %v958_v35 = vpop.f32.mrb[30].mxu0  ;;  %1232 = vmatprep.mubr.bf16.mxu0 %v984_v30  ;;  %v2898_v30 = vld [vmem:[#allocation2 + $0x294] ss:$8 sps:$4 sm:$0xff]   ;;  %v2899_v33 = vld [vmem:[#allocation2 + $0x2a0] ss:$8 sps:$4 sm:$0xff]  }
 0x2fe   : > { %v959_v36 = vadd.f32 %v958_v35, %v850_v44  ;;  %v960_v37 = vpop.f32.mrb[31].mxu0  ;;  %1233 = vmatmul.mubr.bf16.gmra.mrb[40].mxu0 %v983_v29  ;;  %v975_v39 = vmax.f32 %v955_v32, 0.0  ;;  %v2893_v29 = vld [vmem:[#allocation2 + $0x280] ss:$8 sps:$4 sm:$0xff]   ;;  %v2901_v32 = vld [vmem:[#allocation2 + $0x2a4] ss:$8 sps:$4 sm:$0xff]  }
 0x2ff   : > { %v961_v38 = vadd.f32 %v960_v37, %v854_v45  ;;  %v976_v41 = vmax.f32 %v957_v34, 0.0  ;;  %v2904_v34 = vld [vmem:[#allocation2 + $0x2b4] ss:$8 sps:$4 sm:$0xff]   ;;  %v2902_v35 = vld [vmem:[#allocation2 + $0x2b0] ss:$8 sps:$4 sm:$0xff]  }
 0x300   : > { %v977_v40 = vmax.f32 %v959_v36, 0.0  ;;  %v2907_v36 = vld [vmem:[#allocation2 + $0x2c4] ss:$8 sps:$4 sm:$0xff]   ;;  %v2905_v37 = vld [vmem:[#allocation2 + $0x2c0] ss:$8 sps:$4 sm:$0xff]  }
 0x301   : > { %v978_v42 = vmax.f32 %v961_v38, 0.0  ;;  %v2910_v38 = vld [vmem:[#allocation2 + $0x2d4] ss:$8 sps:$4 sm:$0xff]  }
 0x302   : > { %v985_v43 = vpack.c.bf16 %v977_v40, %v975_v39  ;;  %v2908_v39 = vld [vmem:[#allocation2 + $0x2d0] ss:$8 sps:$4 sm:$0xff]   ;;  %v2913_v40 = vld [vmem:[#allocation2 + $0x2e4] ss:$8 sps:$4 sm:$0xff]  }
 0x303   : > { %v986_v47 = vpack.c.bf16 %v978_v42, %v976_v41  ;;  %v2911_v41 = vld [vmem:[#allocation2 + $0x2e0] ss:$8 sps:$4 sm:$0xff]   ;;  %v2916_v42 = vld [vmem:[#allocation2 + $0x2f4] ss:$8 sps:$4 sm:$0xff]  }
 0x305   : > { %1242 = vmatprep.mubr.bf16.mxu0 %v986_v47  ;;  %v2583_v47 = vld [vmem:[%s3475_s6 + $0x2] sm:$0x3] }
 0x306   : > { %1243 = vmatmul.mubr.bf16.gmra.mrb[44].mxu0 %v985_v43  ;;  %v2914_v43 = vld [vmem:[#allocation2 + $0x2f0] ss:$8 sps:$4 sm:$0xff]  }
 0x307   : > { %1690 = vmatprep.mubr.bf16.mxu0 %v3083_v0 }
 0x3c1   : > { %v1214_v51 = vpop.f32.mrb[32].mxu0 }
 0x3c2   : > { %v1216_v52 = vpop.f32.mrb[33].mxu0 }
 0x3c3   : > { %v1218_v53 = vpop.f32.mrb[34].mxu0 }
 0x3c4   : > { %v1253_v49 = vpack.c.bf16 %v1218_v53, %v1214_v51  ;;  %v1220_v50 = vpop.f32.mrb[35].mxu0  ;;  %v1267_v51 = vrot.slane %v2583_v47, %v3259_v46 }
 0x3c5   : > { %v1254_v54 = vpack.c.bf16 %v1220_v50, %v1216_v52  ;;  %v1271_v52 = vrot.slane %v2583_v47, %v3264_v48 }
 0x3c7   : > { %1274 = vmatprep.subr.bf16.mxu1 %v1254_v54 }
 0x3c8   : > { %1275 = vmatpush1.bf16.msra.mxu1 %v1253_v49 }
 0x3c9   : > { %v1224_v44 = vpop.f32.mrb[36].mxu0 }
 0x3ca   : > { %v1226_v45 = vpop.f32.mrb[37].mxu0 }
 0x3cb   : > { %v1228_v55 = vpop.f32.mrb[38].mxu0 }
 0x3cc   : > { %v1255_v56 = vpack.c.bf16 %v1228_v55, %v1224_v44  ;;  %v1230_v57 = vpop.f32.mrb[39].mxu0 }
 0x3cd   : > { %v1256_v58 = vpack.c.bf16 %v1230_v57, %v1226_v45 }
 0x3cf   : > { %1276 = vmatprep.subr.bf16.mxu1 %v1256_v58 }
 0x3d0   : > { %1277 = vmatpush1.bf16.msra.mxu1 %v1255_v56 }
 0x3d1   : > { %v1234_v59 = vpop.f32.mrb[40].mxu0 }
 0x3d2   : > { %v1236_v60 = vpop.f32.mrb[41].mxu0 }
 0x3d3   : > { %v1238_v61 = vpop.f32.mrb[42].mxu0 }
 0x3d4   : > { %v1257_v62 = vpack.c.bf16 %v1238_v61, %v1234_v59  ;;  %v1240_v63 = vpop.f32.mrb[43].mxu0 }
 0x3d5   : > { %v1258_v1 = vpack.c.bf16 %v1240_v63, %v1236_v60 }
 0x3d7   : > { %1278 = vmatprep.subr.bf16.mxu1 %v1258_v1 }
 0x3d8   : > { %1279 = vmatpush1.bf16.msra.mxu1 %v1257_v62 }
 0x3d9   : > { %v1244_v2 = vpop.f32.mrb[44].mxu0 }
 0x3da   : > { %v1246_v3 = vpop.f32.mrb[45].mxu0 }
 0x3db   : > { %v1248_v4 = vpop.f32.mrb[46].mxu0 }
 0x3dc   : > { %v1259_v5 = vpack.c.bf16 %v1248_v4, %v1244_v2  ;;  %v1250_v6 = vpop.f32.mrb[47].mxu0 }
 0x3dd   : > { %v1260_v7 = vpack.c.bf16 %v1250_v6, %v1246_v3 }
 0x3df   : > { %1280 = vmatprep.subr.bf16.mxu1 %v1260_v7 }
 0x3e0   : > { %1281 = vmatpush1.bf16.msra.mxu1 %v1259_v5 }
 0x3e1   : > { %1564 = vmatprep.subr.bf16.mxu1 %v2871_v9 }
 0x3e3   : > { %2584 = vmatmul.mubr.msk.bf16.vlgmr.msra.gmra.mrb[16].mxu1 %vm877_vm3, %v3270_v8 }
 0x3e4   : > { %1316 = vmatprep.mubr.bf16.mxu1 %v3083_v0  ;;  %1565 = vmatpush1.bf16.msra.mxu1 %v2869_v10 }
 0x3e5   : > { %1566 = vmatprep.subr.bf16.mxu1 %v2874_v11 }
 0x3e8   : > { %1567 = vmatpush1.bf16.msra.mxu1 %v2872_v12 }
 0x3e9   : > { %1568 = vmatprep.subr.bf16.mxu1 %v2877_v14 }
 0x3eb   : > { %2585 = vmatmul.mubr.msk.bf16.gmra.mrb[20].mxu1 %vm877_vm3, %v3276_v13 }
 0x3ec   : > { %1326 = vmatprep.mubr.bf16.mxu1 %v3083_v0  ;;  %1569 = vmatpush1.bf16.msra.mxu1 %v2875_v15 }
 0x3ed   : > { %1570 = vmatprep.subr.bf16.mxu1 %v2880_v16 }
 0x3f0   : > { %1571 = vmatpush1.bf16.msra.mxu1 %v2878_v17 }
 0x3f1   : > { %1572 = vmatprep.subr.bf16.mxu1 %v2883_v19 }
 0x3f3   : > { %2586 = vmatmul.mubr.msk.bf16.gmra.mrb[24].mxu1 %vm877_vm3, %v3282_v18 }
 0x3f4   : > { %1336 = vmatprep.mubr.bf16.mxu1 %v3083_v0  ;;  %1573 = vmatpush1.bf16.msra.mxu1 %v2881_v20 }
 0x3f5   : > { %1574 = vmatprep.subr.bf16.mxu1 %v2886_v21 }
 0x3f8   : > { %1575 = vmatpush1.bf16.msra.mxu1 %v2884_v22 }
 0x3f9   : > { %1576 = vmatprep.subr.bf16.mxu1 %v2889_v24 }
 0x3fb   : > { %2587 = vmatmul.mubr.msk.bf16.gmra.mrb[28].mxu1 %vm877_vm3, %v3288_v23 }
 0x3fc   : > { %1577 = vmatpush1.bf16.msra.mxu1 %v2887_v25 }
 0x3fd   : > { %1578 = vmatprep.subr.bf16.mxu1 %v2892_v26 }
 0x400   : > { %1579 = vmatpush1.bf16.msra.mxu1 %v2890_v27 }
 0x401   : > { %1580 = vmatprep.subr.bf16.mxu1 %v2895_v28 }
 0x404   : > { %1581 = vmatpush1.bf16.msra.mxu1 %v2893_v29 }
 0x405   : > { %1582 = vmatprep.subr.bf16.mxu1 %v2898_v30 }
 0x408   : > { %1583 = vmatpush1.bf16.msra.mxu1 %v2896_v31 }
 0x409   : > { %1584 = vmatprep.subr.bf16.mxu1 %v2901_v32 }
 0x40c   : > { %1585 = vmatpush1.bf16.msra.mxu1 %v2899_v33 }
 0x40d   : > { %1586 = vmatprep.subr.bf16.mxu1 %v2904_v34 }
 0x410   : > { %1587 = vmatpush1.bf16.msra.mxu1 %v2902_v35 }
 0x411   : > { %1588 = vmatprep.subr.bf16.mxu1 %v2907_v36 }
 0x414   : > { %1589 = vmatpush1.bf16.msra.mxu1 %v2905_v37 }
 0x415   : > { %1590 = vmatprep.subr.bf16.mxu1 %v2910_v38 }
 0x418   : > { %1591 = vmatpush1.bf16.msra.mxu1 %v2908_v39 }
 0x419   : > { %1592 = vmatprep.subr.bf16.mxu1 %v2913_v40 }
 0x41c   : > { %1593 = vmatpush1.bf16.msra.mxu1 %v2911_v41 }
 0x41d   : > { %1594 = vmatprep.subr.bf16.mxu1 %v2916_v42 }
 0x420   : > { %1595 = vmatpush1.bf16.msra.mxu1 %v2914_v43 }
 0x4b6   : > { %v1308_v53 = vpop.f32.mrb[16].mxu1 }
 0x4b7   : > { %v1309_v49 = vadd.f32 %v1308_v53, %v1267_v51  ;;  %v1310_v50 = vpop.f32.mrb[17].mxu1 }
 0x4b8   : > { %v1311_v54 = vadd.f32 %v1310_v50, %v1271_v52  ;;  %v1312_v44 = vpop.f32.mrb[18].mxu1 }
 0x4b9   : > { %v1313_v45 = vadd.f32 %v1312_v44, %v1267_v51  ;;  %v1314_v55 = vpop.f32.mrb[19].mxu1  ;;  %v1347_v57 = vmax.f32 %v1309_v49, 0.0 }
 0x4ba   : > { %v1315_v56 = vadd.f32 %v1314_v55, %v1271_v52  ;;  %v1348_v59 = vmax.f32 %v1311_v54, 0.0 }
 0x4bb   : > { %v1349_v58 = vmax.f32 %v1313_v45, 0.0 }
 0x4bc   : > { %v1350_v60 = vmax.f32 %v1315_v56, 0.0 }
 0x4bd   : > { %v1363_v61 = vpack.c.bf16 %v1349_v58, %v1347_v57 }
 0x4be   : > { %v1364_v62 = vpack.c.bf16 %v1350_v60, %v1348_v59  ;;  %v1318_v63 = vpop.f32.mrb[20].mxu1 }
 0x4bf   : > { %v1319_v1 = vadd.f32 %v1318_v63, %v1267_v51  ;;  %v1320_v2 = vpop.f32.mrb[21].mxu1 }
 0x4c0   : > { %v1321_v3 = vadd.f32 %v1320_v2, %v1271_v52  ;;  %v1322_v4 = vpop.f32.mrb[22].mxu1  ;;  %1596 = vmatprep.mubr.bf16.mxu1 %v1364_v62 }
 0x4c1   : > { %v1323_v5 = vadd.f32 %v1322_v4, %v1267_v51  ;;  %v1324_v6 = vpop.f32.mrb[23].mxu1  ;;  %1597 = vmatmul.mubr.bf16.vlgmr.msra.gmra.mrb[32].mxu1 %v1363_v61  ;;  %v1351_v9 = vmax.f32 %v1319_v1, 0.0 }
 0x4c2   : > { %v1325_v7 = vadd.f32 %v1324_v6, %v1271_v52  ;;  %v1352_v11 = vmax.f32 %v1321_v3, 0.0 }
 0x4c3   : > { %v1353_v10 = vmax.f32 %v1323_v5, 0.0 }
 0x4c4   : > { %v1354_v12 = vmax.f32 %v1325_v7, 0.0 }
 0x4c5   : > { %v1365_v14 = vpack.c.bf16 %v1353_v10, %v1351_v9  ;;  %v2919_v10 = vld [vmem:[#allocation2 + $0x304] ss:$8 sps:$4 sm:$0xff]  }
 0x4c6   : > { %v1366_v15 = vpack.c.bf16 %v1354_v12, %v1352_v11  ;;  %v1328_v16 = vpop.f32.mrb[24].mxu1  ;;  %v2917_v11 = vld [vmem:[#allocation2 + $0x300] ss:$8 sps:$4 sm:$0xff]   ;;  %v2922_v12 = vld [vmem:[#allocation2 + $0x314] ss:$8 sps:$4 sm:$0xff]  }
 0x4c7   : > { %v1329_v17 = vadd.f32 %v1328_v16, %v1267_v51  ;;  %v1330_v19 = vpop.f32.mrb[25].mxu1  ;;  %v2923_v16 = vld [vmem:[#allocation2 + $0x320] ss:$8 sps:$4 sm:$0xff]  }
 0x4c8   : > { %v1331_v20 = vadd.f32 %v1330_v19, %v1271_v52  ;;  %v1332_v21 = vpop.f32.mrb[26].mxu1  ;;  %1606 = vmatprep.mubr.bf16.mxu1 %v1366_v15  ;;  %v2925_v15 = vld [vmem:[#allocation2 + $0x324] ss:$8 sps:$4 sm:$0xff]   ;;  %v2926_v19 = vld [vmem:[#allocation2 + $0x330] ss:$8 sps:$4 sm:$0xff]  }
 0x4c9   : > { %v1333_v22 = vadd.f32 %v1332_v21, %v1267_v51  ;;  %v1334_v24 = vpop.f32.mrb[27].mxu1  ;;  %1607 = vmatmul.mubr.bf16.gmra.mrb[36].mxu1 %v1365_v14  ;;  %v1355_v26 = vmax.f32 %v1329_v17, 0.0  ;;  %v2920_v14 = vld [vmem:[#allocation2 + $0x310] ss:$8 sps:$4 sm:$0xff]   ;;  %v2928_v17 = vld [vmem:[#allocation2 + $0x334] ss:$8 sps:$4 sm:$0xff]  }
 0x4ca   : > { %v1335_v25 = vadd.f32 %v1334_v24, %v1271_v52  ;;  %v1356_v28 = vmax.f32 %v1331_v20, 0.0  ;;  %v2931_v20 = vld [vmem:[#allocation2 + $0x344] ss:$8 sps:$4 sm:$0xff]   ;;  %v2934_v21 = vld [vmem:[#allocation2 + $0x354] ss:$8 sps:$4 sm:$0xff]  }
 0x4cb   : > { %v1357_v27 = vmax.f32 %v1333_v22, 0.0  ;;  %v2932_v22 = vld [vmem:[#allocation2 + $0x350] ss:$8 sps:$4 sm:$0xff]   ;;  %v2937_v24 = vld [vmem:[#allocation2 + $0x364] ss:$8 sps:$4 sm:$0xff]  }
 0x4cc   : > { %v1358_v29 = vmax.f32 %v1335_v25, 0.0  ;;  %v2940_v25 = vld [vmem:[#allocation2 + $0x374] ss:$8 sps:$4 sm:$0xff]  }
 0x4cd   : > { %v1367_v30 = vpack.c.bf16 %v1357_v27, %v1355_v26  ;;  %v2938_v26 = vld [vmem:[#allocation2 + $0x370] ss:$8 sps:$4 sm:$0xff]   ;;  %v2943_v27 = vld [vmem:[#allocation2 + $0x384] ss:$8 sps:$4 sm:$0xff]  }
 0x4ce   : > { %v1368_v31 = vpack.c.bf16 %v1358_v29, %v1356_v28  ;;  %v1338_v32 = vpop.f32.mrb[28].mxu1  ;;  %v2941_v28 = vld [vmem:[#allocation2 + $0x380] ss:$8 sps:$4 sm:$0xff]   ;;  %v2944_v29 = vld [vmem:[#allocation2 + $0x390] ss:$8 sps:$4 sm:$0xff]  }
 0x4cf   : > { %v1339_v33 = vadd.f32 %v1338_v32, %v1267_v51  ;;  %v1340_v34 = vpop.f32.mrb[29].mxu1  ;;  %v2952_v32 = vld [vmem:[#allocation2 + $0x3b4] ss:$8 sps:$4 sm:$0xff]  }
 0x4d0   : > { %v1341_v35 = vadd.f32 %v1340_v34, %v1271_v52  ;;  %v1342_v36 = vpop.f32.mrb[30].mxu1  ;;  %1616 = vmatprep.mubr.bf16.mxu1 %v1368_v31  ;;  %v2947_v31 = vld [vmem:[#allocation2 + $0x3a0] ss:$8 sps:$4 sm:$0xff]   ;;  %v2955_v34 = vld [vmem:[#allocation2 + $0x3c4] ss:$8 sps:$4 sm:$0xff]  }
 0x4d1   : > { %v1343_v37 = vadd.f32 %v1342_v36, %v1267_v51  ;;  %v1344_v38 = vpop.f32.mrb[31].mxu1  ;;  %1617 = vmatmul.mubr.bf16.gmra.mrb[40].mxu1 %v1367_v30  ;;  %v1359_v40 = vmax.f32 %v1339_v33, 0.0  ;;  %v2949_v30 = vld [vmem:[#allocation2 + $0x3a4] ss:$8 sps:$4 sm:$0xff]   ;;  %v2950_v33 = vld [vmem:[#allocation2 + $0x3b0] ss:$8 sps:$4 sm:$0xff]  }
 0x4d2   : > { %v1345_v39 = vadd.f32 %v1344_v38, %v1271_v52  ;;  %v1360_v42 = vmax.f32 %v1341_v35, 0.0  ;;  %v2953_v35 = vld [vmem:[#allocation2 + $0x3c0] ss:$8 sps:$4 sm:$0xff]   ;;  %v2958_v36 = vld [vmem:[#allocation2 + $0x3d4] ss:$8 sps:$4 sm:$0xff]  }
 0x4d3   : > { %v1361_v41 = vmax.f32 %v1343_v37, 0.0  ;;  %v2956_v37 = vld [vmem:[#allocation2 + $0x3d0] ss:$8 sps:$4 sm:$0xff]   ;;  %v2961_v38 = vld [vmem:[#allocation2 + $0x3e4] ss:$8 sps:$4 sm:$0xff]  }
 0x4d4   : > { %v1362_v43 = vmax.f32 %v1345_v39, 0.0  ;;  %v2959_v39 = vld [vmem:[#allocation2 + $0x3e0] ss:$8 sps:$4 sm:$0xff]  }
 0x4d5   : > { %v1369_v47 = vpack.c.bf16 %v1361_v41, %v1359_v40  ;;  %v2964_v40 = vld [vmem:[#allocation2 + $0x3f4] ss:$8 sps:$4 sm:$0xff]   ;;  %v2962_v41 = vld [vmem:[#allocation2 + $0x3f0] ss:$8 sps:$4 sm:$0xff]  }
 0x4d6   : > { %v1370_v53 = vpack.c.bf16 %v1362_v43, %v1360_v42  ;;  %v2620_v42 = vld [vmem:[%s3475_s6 + $0x4] sm:$0x3] }
 0x4d7   : > { %v1651_v43 = vrot.slane %v2620_v42, %v3259_v46 }
 0x4d8   : > { %1626 = vmatprep.mubr.bf16.mxu1 %v1370_v53 }
 0x4d9   : > { %1627 = vmatmul.mubr.bf16.gmra.mrb[44].mxu1 %v1369_v47  ;;  %v1655_v47 = vrot.slane %v2620_v42, %v3264_v48  ;;  %v404_v42 = vld [vmem:[%s384_s24 + $0x10] sm:$0xff] }
 0x4da   : > { %2074 = vmatprep.mubr.bf16.mxu1 %v3083_v0  ;;  %2143 = vperm.xlu1 %2761, %v404_v42  }
 0x594   : > { %v1598_v49 = vpop.f32.mrb[32].mxu1 }
 0x595   : > { %v1600_v50 = vpop.f32.mrb[33].mxu1 }
 0x596   : > { %v1602_v54 = vpop.f32.mrb[34].mxu1 }
 0x597   : > { %v1637_v44 = vpack.c.bf16 %v1602_v54, %v1598_v49  ;;  %v1604_v45 = vpop.f32.mrb[35].mxu1 }
 0x598   : > { %v1638_v55 = vpack.c.bf16 %v1604_v45, %v1600_v50 }
 0x59a   : > { %1658 = vmatprep.subr.bf16.mxu0 %v1638_v55 }
 0x59b   : > { %1659 = vmatpush1.bf16.msra.mxu0 %v1637_v44 }
 0x59c   : > { %v1608_v51 = vpop.f32.mrb[36].mxu1 }
 0x59d   : > { %v1610_v52 = vpop.f32.mrb[37].mxu1 }
 0x59e   : > { %v1612_v56 = vpop.f32.mrb[38].mxu1 }
 0x59f   : > { %v1639_v57 = vpack.c.bf16 %v1612_v56, %v1608_v51  ;;  %v1614_v58 = vpop.f32.mrb[39].mxu1 }
 0x5a0   : > { %v1640_v59 = vpack.c.bf16 %v1614_v58, %v1610_v52 }
 0x5a2   : > { %1660 = vmatprep.subr.bf16.mxu0 %v1640_v59 }
 0x5a3   : > { %1661 = vmatpush1.bf16.msra.mxu0 %v1639_v57 }
 0x5a4   : > { %v1618_v60 = vpop.f32.mrb[40].mxu1 }
 0x5a5   : > { %v1620_v61 = vpop.f32.mrb[41].mxu1 }
 0x5a6   : > { %v1622_v62 = vpop.f32.mrb[42].mxu1 }
 0x5a7   : > { %v1641_v63 = vpack.c.bf16 %v1622_v62, %v1618_v60  ;;  %v1624_v1 = vpop.f32.mrb[43].mxu1 }
 0x5a8   : > { %v1642_v2 = vpack.c.bf16 %v1624_v1, %v1620_v61 }
 0x5aa   : > { %1662 = vmatprep.subr.bf16.mxu0 %v1642_v2 }
 0x5ab   : > { %1663 = vmatpush1.bf16.msra.mxu0 %v1641_v63 }
 0x5ac   : > { %v1628_v3 = vpop.f32.mrb[44].mxu1 }
 0x5ad   : > { %v1630_v4 = vpop.f32.mrb[45].mxu1 }
 0x5ae   : > { %v1632_v5 = vpop.f32.mrb[46].mxu1 }
 0x5af   : > { %v1643_v6 = vpack.c.bf16 %v1632_v5, %v1628_v3  ;;  %v1634_v7 = vpop.f32.mrb[47].mxu1 }
 0x5b0   : > { %v1644_v9 = vpack.c.bf16 %v1634_v7, %v1630_v4 }
 0x5b2   : > { %1664 = vmatprep.subr.bf16.mxu0 %v1644_v9 }
 0x5b3   : > { %1665 = vmatpush1.bf16.msra.mxu0 %v1643_v6 }
 0x5b4   : > { %1948 = vmatprep.subr.bf16.mxu0 %v2919_v10 }
 0x5b6   : > { %2621 = vmatmul.mubr.msk.bf16.vlgmr.msra.gmra.mrb[48].mxu0 %vm877_vm3, %v3270_v8  ;;  %v2929_v8 = vld [vmem:[#allocation2 + $0x340] ss:$8 sps:$4 sm:$0xff]  }
 0x5b7   : > { %1700 = vmatprep.mubr.bf16.mxu0 %v3083_v0  ;;  %1949 = vmatpush1.bf16.msra.mxu0 %v2917_v11 }
 0x5b8   : > { %1950 = vmatprep.subr.bf16.mxu0 %v2922_v12 }
 0x5bb   : > { %1951 = vmatpush1.bf16.msra.mxu0 %v2920_v14 }
 0x5bc   : > { %1952 = vmatprep.subr.bf16.mxu0 %v2925_v15 }
 0x5be   : > { %2622 = vmatmul.mubr.msk.bf16.gmra.mrb[52].mxu0 %vm877_vm3, %v3276_v13  ;;  %v2935_v13 = vld [vmem:[#allocation2 + $0x360] ss:$8 sps:$4 sm:$0xff]  }
 0x5bf   : > { %1710 = vmatprep.mubr.bf16.mxu0 %v3083_v0  ;;  %1953 = vmatpush1.bf16.msra.mxu0 %v2923_v16 }
 0x5c0   : > { %1954 = vmatprep.subr.bf16.mxu0 %v2928_v17 }
 0x5c3   : > { %1955 = vmatpush1.bf16.msra.mxu0 %v2926_v19 }
 0x5c4   : > { %1956 = vmatprep.subr.bf16.mxu0 %v2931_v20 }
 0x5c6   : > { %2623 = vmatmul.mubr.msk.bf16.gmra.mrb[56].mxu0 %vm877_vm3, %v3282_v18  ;;  %v2946_v18 = vld [vmem:[#allocation2 + $0x394] ss:$8 sps:$4 sm:$0xff]  }
 0x5c7   : > { %1720 = vmatprep.mubr.bf16.mxu0 %v3083_v0  ;;  %1957 = vmatpush1.bf16.msra.mxu0 %v2929_v8 }
 0x5c8   : > { %1958 = vmatprep.subr.bf16.mxu0 %v2934_v21 }
 0x5cb   : > { %1959 = vmatpush1.bf16.msra.mxu0 %v2932_v22 }
 0x5cc   : > { %1960 = vmatprep.subr.bf16.mxu0 %v2937_v24 }
 0x5ce   : > { %2624 = vmatmul.mubr.msk.bf16.gmra.mrb[60].mxu0 %vm877_vm3, %v3288_v23 }
 0x5cf   : > { %1961 = vmatpush1.bf16.msra.mxu0 %v2935_v13 }
 0x5d0   : > { %1962 = vmatprep.subr.bf16.mxu0 %v2940_v25 }
 0x5d3   : > { %1963 = vmatpush1.bf16.msra.mxu0 %v2938_v26 }
 0x5d4   : > { %1964 = vmatprep.subr.bf16.mxu0 %v2943_v27 }
 0x5d7   : > { %1965 = vmatpush1.bf16.msra.mxu0 %v2941_v28 }
 0x5d8   : > { %1966 = vmatprep.subr.bf16.mxu0 %v2946_v18 }
 0x5db   : > { %1967 = vmatpush1.bf16.msra.mxu0 %v2944_v29 }
 0x5dc   : > { %1968 = vmatprep.subr.bf16.mxu0 %v2949_v30 }
 0x5df   : > { %1969 = vmatpush1.bf16.msra.mxu0 %v2947_v31 }
 0x5e0   : > { %1970 = vmatprep.subr.bf16.mxu0 %v2952_v32 }
 0x5e3   : > { %1971 = vmatpush1.bf16.msra.mxu0 %v2950_v33 }
 0x5e4   : > { %1972 = vmatprep.subr.bf16.mxu0 %v2955_v34 }
 0x5e7   : > { %1973 = vmatpush1.bf16.msra.mxu0 %v2953_v35 }
 0x5e8   : > { %1974 = vmatprep.subr.bf16.mxu0 %v2958_v36 }
 0x5eb   : > { %1975 = vmatpush1.bf16.msra.mxu0 %v2956_v37 }
 0x5ec   : > { %1976 = vmatprep.subr.bf16.mxu0 %v2961_v38 }
 0x5ef   : > { %1977 = vmatpush1.bf16.msra.mxu0 %v2959_v39 }
 0x5f0   : > { %1978 = vmatprep.subr.bf16.mxu0 %v2964_v40 }
 0x5f3   : > { %1979 = vmatpush1.bf16.msra.mxu0 %v2962_v41  ;;  %v402_v41 = vld [vmem:[%s384_s24] sm:$0xff] }
 0x5f4   : > { %2133 = vperm.xlu0 %2760, %v402_v41  }
 0x689   : > { %v1692_v53 = vpop.f32.mrb[48].mxu0 }
 0x68a   : > { %v1693_v49 = vadd.f32 %v1692_v53, %v1651_v43  ;;  %v1694_v50 = vpop.f32.mrb[49].mxu0  ;;  %v405_v53 = vld [vmem:[%s384_s24 + $0x18] sm:$0xff] }
 0x68b   : > { %v1695_v54 = vadd.f32 %v1694_v50, %v1655_v47  ;;  %v1696_v44 = vpop.f32.mrb[50].mxu0  ;;  %2148 = vperm.xlu1 %2761, %v405_v53   ;;  %v408_v50 = vld [vmem:[%s384_s24 + $0x30] sm:$0xff] }
 0x68c   : > { %v1697_v45 = vadd.f32 %v1696_v44, %v1651_v43  ;;  %v1698_v55 = vpop.f32.mrb[51].mxu0  ;;  %v1731_v52 = vmax.f32 %v1693_v49, 0.0  ;;  %v407_v49 = vld [vmem:[%s384_s24 + $0x28] sm:$0xff] }
 0x68d   : > { %v1699_v51 = vadd.f32 %v1698_v55, %v1655_v47  ;;  %v1732_v57 = vmax.f32 %v1695_v54, 0.0  ;;  %v409_v54 = vld [vmem:[%s384_s24 + $0x38] sm:$0xff] }
 0x68e   : > { %v1733_v56 = vmax.f32 %v1697_v45, 0.0 }
 0x68f   : > { %v1734_v58 = vmax.f32 %v1699_v51, 0.0  ;;  %2158 = vperm.xlu1 %2761, %v407_v49  }
 0x690   : > { %v1747_v59 = vpack.c.bf16 %v1733_v56, %v1731_v52 }
 0x691   : > { %v1748_v60 = vpack.c.bf16 %v1734_v58, %v1732_v57  ;;  %v1702_v61 = vpop.f32.mrb[52].mxu0 }
 0x692   : > { %v1703_v62 = vadd.f32 %v1702_v61, %v1651_v43  ;;  %v1704_v63 = vpop.f32.mrb[53].mxu0 }
 0x693   : > { %v1705_v1 = vadd.f32 %v1704_v63, %v1655_v47  ;;  %v1706_v2 = vpop.f32.mrb[54].mxu0  ;;  %1980 = vmatprep.mubr.bf16.mxu0 %v1748_v60  ;;  %2168 = vperm.xlu1 %2761, %v409_v54  }
 0x694   : > { %v1707_v3 = vadd.f32 %v1706_v2, %v1651_v43  ;;  %v1708_v4 = vpop.f32.mrb[55].mxu0  ;;  %1981 = vmatmul.mubr.bf16.vlgmr.msra.gmra.mrb[64].mxu0 %v1747_v59  ;;  %v1735_v6 = vmax.f32 %v1703_v62, 0.0 }
 0x695   : > { %v1709_v5 = vadd.f32 %v1708_v4, %v1655_v47  ;;  %v1736_v9 = vmax.f32 %v1705_v1, 0.0 }
 0x696   : > { %v1737_v7 = vmax.f32 %v1707_v3, 0.0 }
 0x697   : > { %v1738_v10 = vmax.f32 %v1709_v5, 0.0 }
 0x698   : > { %v1749_v11 = vpack.c.bf16 %v1737_v7, %v1735_v6 }
 0x699   : > { %v1750_v12 = vpack.c.bf16 %v1738_v10, %v1736_v9  ;;  %v1712_v14 = vpop.f32.mrb[56].mxu0 }
 0x69a   : > { %v1713_v15 = vadd.f32 %v1712_v14, %v1651_v43  ;;  %v1714_v16 = vpop.f32.mrb[57].mxu0  ;;  %v2981_v14 = vld [vmem:[%s3252_s28] sm:$0xff]  }
 0x69b   : > { %v1715_v17 = vadd.f32 %v1714_v16, %v1655_v47  ;;  %v1716_v19 = vpop.f32.mrb[58].mxu0  ;;  %1990 = vmatprep.mubr.bf16.mxu0 %v1750_v12  ;;  %v2983_v16 = vld [vmem:[%s3252_s28 + $0x10] sm:$0xff]  }
 0x69c   : > { %v1717_v20 = vadd.f32 %v1716_v19, %v1651_v43  ;;  %v1718_v8 = vpop.f32.mrb[59].mxu0  ;;  %1991 = vmatmul.mubr.bf16.gmra.mrb[68].mxu0 %v1749_v11  ;;  %v1739_v22 = vmax.f32 %v1713_v15, 0.0  ;;  %v2982_v15 = vld [vmem:[%s3252_s28 + $0x8] sm:$0xff]   ;;  %v2966_v19 = vld [vmem:[%s3476_s7] sm:$0xff]   ;;  %s3427_s28 = scalar_lea.hbm %s3478_s9, %s2678_s27 }
 0x69d   : > { %v1719_v21 = vadd.f32 %v1718_v8, %v1655_v47  ;;  %v1740_v13 = vmax.f32 %v1715_v17, 0.0  ;;  %v2965_v17 = vld [vmem:[%s3476_s7 + $0x40] sm:$0xff]   ;;  %v2970_v8 = vld [vmem:[%s3476_s7 + $0x10] sm:$0xff]  }
 0x69e   : > { %v1741_v24 = vmax.f32 %v1717_v20, 0.0  ;;  %v2967_v20 = vld [vmem:[%s3476_s7 + $0x48] sm:$0xff]  }
 0x69f   : > { %v1742_v25 = vmax.f32 %v1719_v21, 0.0  ;;  %v2971_v21 = vld [vmem:[%s3476_s7 + $0x58] sm:$0xff]  }
 0x6a0   : > { %v1751_v26 = vpack.c.bf16 %v1741_v24, %v1739_v22  ;;  %v2972_v22 = vld [vmem:[%s3476_s7 + $0x18] sm:$0xff]   ;;  %v2973_v24 = vld [vmem:[%s3476_s7 + $0x60] sm:$0xff]  }
 0x6a1   : > { %v1752_v27 = vpack.c.bf16 %v1742_v25, %v1740_v13  ;;  %v1722_v28 = vpop.f32.mrb[60].mxu0  ;;  %v2974_v13 = vld [vmem:[%s3476_s7 + $0x20] sm:$0xff]   ;;  %v2975_v25 = vld [vmem:[%s3476_s7 + $0x68] sm:$0xff]  }
 0x6a2   : > { %v1723_v18 = vadd.f32 %v1722_v28, %v1651_v43  ;;  %v1724_v29 = vpop.f32.mrb[61].mxu0  ;;  %v2978_v28 = vld [vmem:[%s3476_s7 + $0x30] sm:$0xff]  }
 0x6a3   : > { %v1725_v30 = vadd.f32 %v1724_v29, %v1655_v47  ;;  %v1726_v31 = vpop.f32.mrb[62].mxu0  ;;  %2000 = vmatprep.mubr.bf16.mxu0 %v1752_v27  ;;  %v2977_v27 = vld [vmem:[%s3476_s7 + $0x70] sm:$0xff]   ;;  %v2980_v29 = vld [vmem:[%s3476_s7 + $0x38] sm:$0xff]  }
 0x6a4   : > { %v1727_v32 = vadd.f32 %v1726_v31, %v1651_v43  ;;  %v1728_v33 = vpop.f32.mrb[63].mxu0  ;;  %2001 = vmatmul.mubr.bf16.gmra.mrb[72].mxu0 %v1751_v26  ;;  %v1743_v35 = vmax.f32 %v1723_v18, 0.0  ;;  %v403_v43 = vld [vmem:[%s384_s24 + $0x8] sm:$0xff]  ;;  %v2979_v18 = vld [vmem:[%s3476_s7 + $0x78] sm:$0xff]  }
 0x6a5   : > { %v1729_v34 = vadd.f32 %v1728_v33, %v1655_v47  ;;  %v1744_v37 = vmax.f32 %v1725_v30, 0.0  ;;  %2138 = vperm.xlu0 %2760, %v403_v43   ;;  %v406_v47 = vld [vmem:[%s384_s24 + $0x20] sm:$0xff]  ;;  %v2976_v26 = vld [vmem:[%s3476_s7 + $0x28] sm:$0xff]   ;;  %v2134_v33 = vpop.permute.xlu0 %2133  ;;  %s3018_s24 = scalar_lea.vmem %s3017_s26, 32 }
 0x6a6   : > { %v1745_v36 = vmax.f32 %v1727_v32, 0.0  ;;  %v2657_v30 = vld [vmem:[%s3475_s6 + $0x6] sm:$0x3]  ;;  %p3020_p3 = scmp.lt.s32.totalorder %s3018_s24, %s3012_s25 }
 0x6a7   : > { %v1746_v38 = vmax.f32 %v1729_v34, 0.0  ;;  %v3398_v31 = vrot.slane %v2657_v30, %v3259_v46  ;;  %v3401_v32 = vrot.slane %v2657_v30, %v3264_v48 }
 0x6a8   : > { %v1753_v39 = vpack.c.bf16 %v1745_v36, %v1743_v35  ;;  %p3021_p4 = por %p3020_p3, %p3019_p2 }
 0x6a9   : > { %v1754_v40 = vpack.c.bf16 %v1746_v38, %v1744_v37  ;;  %2153 = vperm.xlu0 %2760, %v406_v47  }
 0x6aa   : > { %p3022_p7 = pnand %p3021_p4, %p3015_p12 }
 0x6ab   : > { %2010 = vmatprep.mubr.bf16.mxu0 %v1754_v40 }
 0x6ac   : > { %2011 = vmatmul.mubr.bf16.gmra.mrb[76].mxu0 %v1753_v39 }
 0x6ad   : > { %2163 = vperm.xlu0 %2760, %v408_v50  }
 0x724   : > { %v2139_v46 = vpop.permute.xlu0 %2138 }
 0x767   : > { %v1982_v44 = vpop.f32.mrb[64].mxu0 }
 0x768   : > { %v1984_v45 = vpop.f32.mrb[65].mxu0 }
 0x769   : > { %v1986_v55 = vpop.f32.mrb[66].mxu0 }
 0x76a   : > { %v2021_v51 = vpack.c.bf16 %v1986_v55, %v1982_v44  ;;  %v1988_v52 = vpop.f32.mrb[67].mxu0 }
 0x76b   : > { %v2022_v56 = vpack.c.bf16 %v1988_v52, %v1984_v45  ;;  %v2144_v45 = vpop.permute.xlu1 %2143 }
 0x76d   : > { %2042 = vmatprep.subr.bf16.mxu1 %v2022_v56 }
 0x76e   : > { %2043 = vmatpush1.bf16.msra.mxu1 %v2021_v51 }
 0x76f   : > { %v1992_v57 = vpop.f32.mrb[68].mxu0 }
 0x770   : > { %v1994_v58 = vpop.f32.mrb[69].mxu0 }
 0x771   : > { %v1996_v59 = vpop.f32.mrb[70].mxu0 }
 0x772   : > { %v2023_v60 = vpack.c.bf16 %v1996_v59, %v1992_v57  ;;  %v1998_v61 = vpop.f32.mrb[71].mxu0 }
 0x773   : > { %v2024_v62 = vpack.c.bf16 %v1998_v61, %v1994_v58 }
 0x775   : > { %2044 = vmatprep.subr.bf16.mxu1 %v2024_v62 }
 0x776   : > { %2045 = vmatpush1.bf16.msra.mxu1 %v2023_v60 }
 0x777   : > { %v2002_v63 = vpop.f32.mrb[72].mxu0 }
 0x778   : > { %v2004_v1 = vpop.f32.mrb[73].mxu0 }
 0x779   : > { %v2006_v2 = vpop.f32.mrb[74].mxu0 }
 0x77a   : > { %v2025_v3 = vpack.c.bf16 %v2006_v2, %v2002_v63  ;;  %v2008_v4 = vpop.f32.mrb[75].mxu0 }
 0x77b   : > { %v2026_v5 = vpack.c.bf16 %v2008_v4, %v2004_v1 }
 0x77d   : > { %2046 = vmatprep.subr.bf16.mxu1 %v2026_v5  ;;  %v2149_v5 = vpop.permute.xlu1 %2148 }
 0x77e   : > { %2047 = vmatpush1.bf16.msra.mxu1 %v2025_v3 }
 0x77f   : > { %v2012_v6 = vpop.f32.mrb[76].mxu0 }
 0x780   : > { %v2014_v7 = vpop.f32.mrb[77].mxu0 }
 0x781   : > { %v2016_v9 = vpop.f32.mrb[78].mxu0 }
 0x782   : > { %v2027_v10 = vpack.c.bf16 %v2016_v9, %v2012_v6  ;;  %v2018_v11 = vpop.f32.mrb[79].mxu0 }
 0x783   : > { %v2028_v12 = vpack.c.bf16 %v2018_v11, %v2014_v7 }
 0x785   : > { %2048 = vmatprep.subr.bf16.mxu1 %v2028_v12 }
 0x786   : > { %2049 = vmatpush1.bf16.msra.mxu1 %v2027_v10 }
 0x787   : > { %2684 = vmatprep.subr.bf16.mxu1 %v2965_v17 }
 0x789   : > { %2658 = vmatmul.mubr.msk.bf16.vlgmr.msra.gmra.mrb[48].mxu1 %vm877_vm3, %v2981_v14 }
 0x78a   : > { %2084 = vmatprep.mubr.bf16.mxu1 %v3083_v0  ;;  %2685 = vmatpush3.bf16.msra.mxu1 %v2966_v19 }
 0x78b   : > { %2686 = vmatprep.subr.bf16.mxu1 %v2967_v20 }
 0x791   : > { %2659 = vmatmul.mubr.msk.bf16.gmra.mrb[52].mxu1 %vm877_vm3, %v2982_v15 }
 0x792   : > { %2094 = vmatprep.mubr.bf16.mxu1 %v3083_v0 }
 0x799   : > { %2660 = vmatmul.mubr.msk.bf16.gmra.mrb[56].mxu1 %vm877_vm3, %v2983_v16 }
 0x79a   : > { %2104 = vmatprep.mubr.bf16.mxu1 %v3083_v0  ;;  %v2968_v0 = vld [vmem:[%s3476_s7 + $0x8] sm:$0xff]  }
 0x79b   : > { %2687 = vmatpush3.bf16.msra.mxu1 %v2968_v0 }
 0x7a1   : > { %2661 = vmatmul.mubr.msk.bf16.gmra.mrb[60].mxu1 %vm877_vm3, %v3288_v23  ;;  %v2969_v23 = vld [vmem:[%s3476_s7 + $0x50] sm:$0xff]  }
 0x7a2   : > { %2688 = vmatprep.subr.bf16.mxu1 %v2969_v23 }
 0x7a3   : > { %2689 = vmatpush3.bf16.msra.mxu1 %v2970_v8  ;;  %v2154_v8 = vpop.permute.xlu0 %2153 }
 0x7a4   : > { %2690 = vmatprep.subr.bf16.mxu1 %v2971_v21 }
 0x7a7   : > { %2691 = vmatpush3.bf16.msra.mxu1 %v2972_v22 }
 0x7a8   : > { %2692 = vmatprep.subr.bf16.mxu1 %v2973_v24 }
 0x7ab   : > { %2693 = vmatpush3.bf16.msra.mxu1 %v2974_v13 }
 0x7ac   : > { %2694 = vmatprep.subr.bf16.mxu1 %v2975_v25 }
 0x7af   : > { %2695 = vmatpush3.bf16.msra.mxu1 %v2976_v26 }
 0x7b0   : > { %2696 = vmatprep.subr.bf16.mxu1 %v2977_v27  ;;  %v2159_v27 = vpop.permute.xlu1 %2158 }
 0x7b3   : > { %2697 = vmatpush3.bf16.msra.mxu1 %v2978_v28 }
 0x7b4   : > { %2698 = vmatprep.subr.bf16.mxu1 %v2979_v18 }
 0x7b7   : > { %2699 = vmatpush3.bf16.msra.mxu1 %v2980_v29 }
 0x85c   : > { %v2076_v34 = vpop.f32.mrb[48].mxu1 }
 0x85d   : > { %v2077_v35 = vadd.f32 %v2076_v34, %v3398_v31  ;;  %v2078_v36 = vpop.f32.mrb[49].mxu1 }
 0x85e   : > { %v2079_v37 = vadd.f32 %v2078_v36, %v3401_v32  ;;  %v2080_v38 = vpop.f32.mrb[50].mxu1 }
 0x85f   : > { %v2115_v39 = vmax.f32 %v2077_v35, 0.0  ;;  %v2081_v40 = vadd.f32 %v2080_v38, %v3398_v31  ;;  %v2082_v41 = vpop.f32.mrb[51].mxu1 }
 0x860   : > { %v2116_v42 = vmax.f32 %v2079_v37, 0.0  ;;  %v2083_v43 = vadd.f32 %v2082_v41, %v3401_v32 }
 0x861   : > { %v2117_v53 = vmax.f32 %v2081_v40, 0.0  ;;  %v2171_v48 = vmul.f32 %v2134_v33, %v2115_v39 }
 0x862   : > { %v2118_v47 = vmax.f32 %v2083_v43, 0.0  ;;  %v2172_v50 = vmul.f32 %v2134_v33, %v2116_v42  ;;  %v2164_v43 = vpop.permute.xlu0 %2163 }
 0x863   : > { %v2173_v49 = vmul.f32 %v2139_v46, %v2117_v53 }
 0x864   : > { %v2086_v54 = vpop.f32.mrb[52].mxu1  ;;  %v2174_v44 = vmul.f32 %v2139_v46, %v2118_v47 }
 0x865   : > { %v2087_v55 = vadd.f32 %v2086_v54, %v3398_v31  ;;  %v2187_v51 = vadd.f32 %v2173_v49, %v2171_v48  ;;  %v2088_v52 = vpop.f32.mrb[53].mxu1  ;;  %v2169_v49 = vpop.permute.xlu1 %2168 }
 0x866   : > { %v2200_v56 = vadd.f32 %v2174_v44, %v2172_v50  ;;  %v2089_v57 = vadd.f32 %v2088_v52, %v3401_v32  ;;  %v2090_v58 = vpop.f32.mrb[54].mxu1 }
 0x867   : > { %v2119_v59 = vmax.f32 %v2087_v55, 0.0  ;;  %v2091_v60 = vadd.f32 %v2090_v58, %v3398_v31  ;;  %v2092_v61 = vpop.f32.mrb[55].mxu1 }
 0x868   : > { %v2120_v62 = vmax.f32 %v2089_v57, 0.0  ;;  %v2093_v63 = vadd.f32 %v2092_v61, %v3401_v32 }
 0x869   : > { %v2175_v1 = vmul.f32 %v2144_v45, %v2119_v59  ;;  %v2121_v2 = vmax.f32 %v2091_v60, 0.0 }
 0x86a   : > { %v2176_v3 = vmul.f32 %v2144_v45, %v2120_v62  ;;  %v2122_v4 = vmax.f32 %v2093_v63, 0.0 }
 0x86b   : > { %v2188_v6 = vadd.f32 %v2187_v51, %v2175_v1  ;;  %v2177_v7 = vmul.f32 %v2149_v5, %v2121_v2 }
 0x86c   : > { %v2201_v9 = vadd.f32 %v2200_v56, %v2176_v3  ;;  %v2178_v10 = vmul.f32 %v2149_v5, %v2122_v4  ;;  %v2096_v11 = vpop.f32.mrb[56].mxu1 }
 0x86d   : > { %v2189_v12 = vadd.f32 %v2188_v6, %v2177_v7  ;;  %v2097_v14 = vadd.f32 %v2096_v11, %v3398_v31  ;;  %v2098_v15 = vpop.f32.mrb[57].mxu1  ;;  %v2247_v7 = vld [vmem:[%s3477_s8] sm:$0x1] }
 0x86e   : > { %v2202_v16 = vadd.f32 %v2201_v9, %v2178_v10  ;;  %v2099_v17 = vadd.f32 %v2098_v15, %v3401_v32  ;;  %v2100_v19 = vpop.f32.mrb[58].mxu1 }
 0x86f   : > { %v2123_v20 = vmax.f32 %v2097_v14, 0.0  ;;  %v2101_v0 = vadd.f32 %v2100_v19, %v3398_v31  ;;  %v2102_v23 = vpop.f32.mrb[59].mxu1 }
 0x870   : > { %v2124_v21 = vmax.f32 %v2099_v17, 0.0  ;;  %v2103_v22 = vadd.f32 %v2102_v23, %v3401_v32 }
 0x871   : > { %v2179_v24 = vmul.f32 %v2154_v8, %v2123_v20  ;;  %v2125_v13 = vmax.f32 %v2101_v0, 0.0 }
 0x872   : > { %v2180_v25 = vmul.f32 %v2154_v8, %v2124_v21  ;;  %v2126_v26 = vmax.f32 %v2103_v22, 0.0 }
 0x873   : > { %v2190_v28 = vadd.f32 %v2189_v12, %v2179_v24  ;;  %v2181_v18 = vmul.f32 %v2159_v27, %v2125_v13 }
 0x874   : > { %v2203_v29 = vadd.f32 %v2202_v16, %v2180_v25  ;;  %v2182_v30 = vmul.f32 %v2159_v27, %v2126_v26  ;;  %v2106_v33 = vpop.f32.mrb[60].mxu1 }
 0x875   : > { %v2191_v34 = vadd.f32 %v2190_v28, %v2181_v18  ;;  %v2107_v35 = vadd.f32 %v2106_v33, %v3398_v31  ;;  %v2108_v36 = vpop.f32.mrb[61].mxu1 }
 0x876   : > { %v2204_v37 = vadd.f32 %v2203_v29, %v2182_v30  ;;  %v2109_v38 = vadd.f32 %v2108_v36, %v3401_v32  ;;  %v2110_v39 = vpop.f32.mrb[62].mxu1 }
 0x877   : > { %v2127_v40 = vmax.f32 %v2107_v35, 0.0  ;;  %v2111_v41 = vadd.f32 %v2110_v39, %v3398_v31  ;;  %v2112_v42 = vpop.f32.mrb[63].mxu1 }
 0x878   : > { %v2128_v46 = vmax.f32 %v2109_v38, 0.0  ;;  %v2113_v53 = vadd.f32 %v2112_v42, %v3401_v32 }
 0x879   : > { %v2183_v47 = vmul.f32 %v2164_v43, %v2127_v40  ;;  %v2129_v48 = vmax.f32 %v2111_v41, 0.0 }
 0x87a   : > { %v2184_v50 = vmul.f32 %v2164_v43, %v2128_v46  ;;  %v2130_v54 = vmax.f32 %v2113_v53, 0.0 }
 0x87b   : > { %v2192_v44 = vadd.f32 %v2191_v34, %v2183_v47  ;;  %v2185_v45 = vmul.f32 %v2169_v49, %v2129_v48 }
 0x87c   : > { %v2205_v55 = vadd.f32 %v2204_v37, %v2184_v50  ;;  %v2186_v51 = vmul.f32 %v2169_v49, %v2130_v54 }
 0x87d   : > { %v2193_v52 = vadd.f32 %v2192_v44, %v2185_v45 }
 0x87e   : > { %v2206_v56 = vadd.f32 %v2205_v55, %v2186_v51 }
 0x87f   : > { %v2194_v57 = vrot.slane %v2193_v52, 4 }
 0x880   : > { %v2207_v58 = vrot.slane %v2206_v56, 4 }
 0x881   : > { %v2195_v31 = vadd.f32 %v2194_v57, %v2193_v52 }
 0x882   : > { %v2208_v59 = vadd.f32 %v2207_v58, %v2206_v56 }
 0x883   : > { %v2196_v60 = vrot.slane %v2195_v31, 2 }
 0x884   : > { %v2209_v61 = vrot.slane %v2208_v59, 2 }
 0x885   : > { %v2197_v32 = vadd.f32 %v2196_v60, %v2195_v31 }
 0x886   : > { %v2210_v62 = vadd.f32 %v2209_v61, %v2208_v59 }
 0x887   : > { %v2198_v63 = vrot.slane %v2197_v32, 1 }
 0x888   : > { %v2211_v1 = vrot.slane %v2210_v62, 1 }
 0x889   : > { %v2199_v2 = vadd.f32 %v2198_v63, %v2197_v32 }
 0x88a   : > { %v2212_v3 = vadd.f32 %v2211_v1, %v2210_v62 }
 0x88b   : > { %v2213_v5 = vpack.c.bf16 %v2199_v2, %v2199_v2 }
 0x88c   : > { %v2214_v4 = vpack.c.bf16 %v2212_v3, %v2212_v3 }
 0x88e   : > { %2376 = vmatprep.mubr.bf16.mxu1 %v2214_v4 }
 0x88f   : > { %2377 = vmatmul.mubr.bf16.vlgmr.msra.gmra.mrb[64].mxu1 %v2213_v5 }
 0x962   : > { %v2700_v6 = vpop.f32.mrb[64].mxu1 }
 0x963   : > { %v2701_v9 = vpop.f32.mrb[65].mxu1 }
 0x964   : > { %v2702_v10 = vadd.f32 %v2701_v9, %v2700_v6  ;;  %v2703_v11 = vpop.f32.mrb[66].mxu1 }
 0x965   : > { %v2704_v12 = vpop.f32.mrb[67].mxu1 }
 0x966   : > { %v2379_v14 = vadd.f32 %v2702_v10, %v2247_v7 }
 0x968   : > { %2384 = vst [vmem:[%s369_s29] sm:$0x1] %v2379_v14 }
 0x969   : > { %3025 = shalt.err (!%p3022_p7)
}
 0x96a   : > { %s3026_s23 = scalar_lea.hbm %s3427_s28, 16  ;;  %s3030_s29 = scalar_lea.hbm %s3478_s9, 128 }
 0x96b   : > { %p3027_p8 = scmp.ne.s32.totalorder %s3427_s28, %s3026_s23  ;;  %p3031_p1 = scmp.lt.u32.totalorder %s3427_s28, %s3478_s9 }
 0x96c   : > { %p3032_p0 = scmp.lt.u32.totalorder %s3030_s29, %s3026_s23  ;;  %p3034_p6 = scmp.lt.u32.totalorder %s3026_s23, %s3427_s28 }
 0x96d   : > { %p3028_p11 = pnand %p3027_p8, %p3489_p9 }
 0x96e   : > { %p3033_p5 = por %p3032_p0, %p3031_p1 }
 0x96f   : > { %p3029_p13 = pneg %p3028_p11 }
 0x970   : > { %p3035_p10 = por %p3034_p6, %p3033_p5 }
 0x972   : > { %p3036_p12 = pnand %p3035_p10, %p3029_p13 }
 0x974   : > { %3039 = shalt.err (!%p3036_p12)
}
 0x975   : > { %2710 = dma.vmem_to_hbm [thread:$0]  (%p3489_p9), %s3429_s14, 16, %s3427_s28, %s2386_s22  }
 0x976 PF: > { %p2722_p2 = scmp.ge.s32.totalorder %s3078_s12, 2  ;;  %s2410_s25 = sand.u32 1, %s3066_s30  }
 0x977   : > { %p3490_p3 = scmp.ne.s32.totalorder %s3483_s20, 0  ;;  %s2411_s13 = scalar_lea.sflag [#allocation4], %s2410_s25 }
 0x979   : > { %p2717_p4 = pnand %p2722_p2, %p3490_p3 }
 0x97b   : > { %3061 = dma.done.wait (!%p2717_p4), %s2411_s13, 16  }
 0x97c   : > { %3063 = vsyncadd (!%p2717_p4), %s2411_s13, 4294967280  ;;  %p20_p7 = scmp.ge.s32.totalorder %s3161_s15, 10   ;;  %s3491_s30 = smov %s3070_s10 }
 0x97d   : > { %s3492_s10 = smov %s3074_s11  ;;  %s3493_s11 = smov %s3172_s18 }
 0x97e   : > { %s3494_s12 = smov %s3161_s15  ;;  %22 = sbr.rel (!%p20_p7) target bundleno = 4 (0x4), region = 108 }
 0x985   :  { %2415 = vsyncpa [#allocation3], 1 }
 0x986   :  { %2417 = vsyncpa [#allocation3 + $0x1], 1 }
 0x987   :  { %2418 = vsyncpa [#allocation4], 1 }
 0x988   :  { %2420 = vsyncpa [#allocation4 + $0x1], 1 }

</bundles_post_ra>
